<compile_context>
chip_gen: v7x
topology: tpu7x:2x2x1
jax: 0.10.0
libtpu: 0.0.40
codegen_flags: <defaults>
</compile_context>

<pallas_src>
import jax
import jax.numpy as jnp
from jax.experimental import pallas as pl
from jax.experimental.pallas import tpu as pltpu


def _mlp_kernel(x_ref, w1_ref, b1_ref, w2_ref, b2_ref, w3_ref, b3_ref, o_ref):
    """Fused 3-layer MLP: relu(relu(x@W1+b1)@W2+b2)@W3+b3.

    x arrives f32 and is cast to bf16 in-kernel (MXU-native operand);
    accumulation, bias add and ReLU are f32. W3/b3 arrive zero-padded to a
    lane-dense (multiple-of-128) output width so the final store is a full
    unmasked vector store. Output is stored bf16.
    """
    x = x_ref[...].astype(jnp.bfloat16)
    h1 = jnp.dot(x, w1_ref[...], preferred_element_type=jnp.float32)
    h1 = jnp.maximum(h1 + b1_ref[...], 0.0).astype(jnp.bfloat16)
    h2 = jnp.dot(h1, w2_ref[...], preferred_element_type=jnp.float32)
    h2 = jnp.maximum(h2 + b2_ref[...], 0.0).astype(jnp.bfloat16)
    out = jnp.dot(h2, w3_ref[...], preferred_element_type=jnp.float32) + b3_ref[...]
    o_ref[...] = out.astype(o_ref.dtype)


def prepare_params(w1, b1, w2, b2, w3, b3):
    """One-time parameter preparation (do this at param-creation time, NOT per call).

    * Weights cast to bf16 (MXU-native operands).
    * Biases kept f32, reshaped to (1, N).
    * Final layer padded to a lane-dense output width (multiple of 128) so the
      kernel's final store is a full unmasked vst.
    """
    out_dim = w3.shape[1]
    n_pad = 128 * pl.cdiv(out_dim, 128)
    w3p = jnp.pad(w3, ((0, 0), (0, n_pad - out_dim))) if n_pad != out_dim else w3
    b3p = b3.reshape(1, -1)
    if n_pad != out_dim:
        b3p = jnp.pad(b3p, ((0, 0), (0, n_pad - out_dim)))
    return {
        "w1": w1.astype(jnp.bfloat16), "b1": b1.reshape(1, -1).astype(jnp.float32),
        "w2": w2.astype(jnp.bfloat16), "b2": b2.reshape(1, -1).astype(jnp.float32),
        "w3": w3p.astype(jnp.bfloat16), "b3": b3p.astype(jnp.float32),
        "out_dim": int(out_dim),
    }


def _num_tensorcores():
    """One batch tile per TensorCore: 1 on v5e/v6e (single TC), 2 on v7x."""
    try:
        kind = jax.devices()[0].device_kind.lower()
    except Exception:  # no devices queried yet / CPU fallback
        return 1
    return 2 if "v7" in kind else 1


def feedforward_nn(x, params, *, num_batch_tiles=None):
    """Pallas implementation of FeedForwardNN.forward.

    x:      (B, input_size) float32
    params: dict from prepare_params() (bf16 weights, f32 biases, padded layer 3)
    returns (B, out_dim) float32
    """
    B, in_dim = x.shape
    w1, b1 = params["w1"], params["b1"]
    w2, b2 = params["w2"], params["b2"]
    w3, b3 = params["w3"], params["b3"]
    out_dim = params["out_dim"]
    h1_dim = w1.shape[1]
    h2_dim = w2.shape[1]
    n_pad = w3.shape[1]

    # --- grid: exactly one batch tile per TensorCore -------------------------
    if num_batch_tiles is None:
        num_batch_tiles = _num_tensorcores()
    # Tile rows rounded to a multiple of 8 (f32 sublane constraint on the
    # second-to-last block dim); for B=512 this gives 512 (v5e/v6e) or 256 (v7x).
    batch_tile = 8 * pl.cdiv(pl.cdiv(B, num_batch_tiles), 8)
    b_padded = batch_tile * num_batch_tiles
    if b_padded != B:
        x = jnp.pad(x, ((0, b_padded - B), (0, 0)))

    grid = (num_batch_tiles,)

    # x / output march over batch tiles; weights & biases are grid-invariant
    # (whole array as a single block, so no (8,128) divisibility issue).
    # TODO(synk): if hidden sizes grow large, single-buffer the invariant
    # weight/bias specs (pipeline_mode=pl.Buffered(1)) — matters on v7x (64 MiB
    # VMEM); irrelevant at 32-wide hiddens (<25 KiB of weights).
    in_specs = [
        pl.BlockSpec((batch_tile, in_dim), lambda i: (i, 0)),   # x tile (f32)
        pl.BlockSpec((in_dim, h1_dim), lambda i: (0, 0)),       # W1 (bf16)
        pl.BlockSpec((1, h1_dim), lambda i: (0, 0)),            # b1 (f32)
        pl.BlockSpec((h1_dim, h2_dim), lambda i: (0, 0)),       # W2 (bf16)
        pl.BlockSpec((1, h2_dim), lambda i: (0, 0)),            # b2 (f32)
        pl.BlockSpec((h2_dim, n_pad), lambda i: (0, 0)),        # W3 (bf16, padded N)
        pl.BlockSpec((1, n_pad), lambda i: (0, 0)),             # b3 (f32, padded N)
    ]
    out_specs = pl.BlockSpec((batch_tile, n_pad), lambda i: (i, 0))

    # Advisory cost estimate so XLA orders the tiny custom call well relative
    # to the surrounding (fused) slice/cast ops.
    flops = 2 * b_padded * (in_dim * h1_dim + h1_dim * h2_dim + h2_dim * n_pad)
    bytes_accessed = (
        b_padded * in_dim * 4                                   # x (f32)
        + (in_dim * h1_dim + h1_dim * h2_dim + h2_dim * n_pad) * 2  # weights bf16
        + (h1_dim + h2_dim + n_pad) * 4                         # biases f32
        + b_padded * n_pad * 2                                  # output bf16
    )
    cost = pl.CostEstimate(flops=flops, transcendentals=0,
                           bytes_accessed=bytes_accessed)

    out_padded = pl.pallas_call(
        _mlp_kernel,
        out_shape=jax.ShapeDtypeStruct((b_padded, n_pad), jnp.bfloat16),
        grid=grid,
        in_specs=in_specs,
        out_specs=out_specs,
        compiler_params=pltpu.CompilerParams(
            dimension_semantics=("parallel",),
            vmem_limit_bytes=32 * 1024 * 1024,
        ),
        cost_estimate=cost,
    )(x, w1, b1, w2, b2, w3, b3)

    # Single fused XLA op: slice off batch/lane padding and cast back to f32.
    return out_padded[:B, :out_dim].astype(jnp.float32)


def _init_linear(key, fan_in, fan_out):
    """Deterministic init mimicking torch.nn.Linear default (Kaiming uniform)."""
    kw, kb = jax.random.split(key)
    bound = 1.0 / jnp.sqrt(jnp.float32(fan_in))
    w = jax.random.uniform(kw, (fan_in, fan_out), jnp.float32, -bound, bound)
    b = jax.random.uniform(kb, (1, fan_out), jnp.float32, -bound, bound)
    return w, b


def _ref_bf16(x, w1, b1, w2, b2, w3, b3):
    """Plain-JAX reference with the same matmul precision pattern as the kernel."""
    h = jnp.dot(x.astype(jnp.bfloat16), w1.astype(jnp.bfloat16),
                preferred_element_type=jnp.float32) + b1
    h = jnp.maximum(h, 0.0).astype(jnp.bfloat16)
    h = jnp.dot(h, w2.astype(jnp.bfloat16),
                preferred_element_type=jnp.float32) + b2
    h = jnp.maximum(h, 0.0).astype(jnp.bfloat16)
    return jnp.dot(h, w3.astype(jnp.bfloat16),
                   preferred_element_type=jnp.float32) + b3


if __name__ == "__main__":
    # Shapes consistent with the module:
    #   input_size = number of CSV feature columns (synthetic: 16)
    #   hidden_size1 = 32, hidden_size2 = 32, output_dim = 1 (dl_brate regression)
    # batch=512: one 512-row tile on v5e/v6e (grid=(1,)), two 256-row tiles on v7x.
    batch = 512
    input_size = 16
    hidden_size1 = 32
    hidden_size2 = 32
    output_dim = 1

    root = jax.random.PRNGKey(0)
    kx, k1, k2, k3 = jax.random.split(root, 4)

    x = jax.random.normal(kx, (batch, input_size), jnp.float32)
    w1, b1 = _init_linear(k1, input_size, hidden_size1)
    w2, b2 = _init_linear(k2, hidden_size1, hidden_size2)
    w3, b3 = _init_linear(k3, hidden_size2, output_dim)

    # One-time parameter preparation (bf16 cast + lane-dense pad of layer 3).
    params = prepare_params(w1, b1, w2, b2, w3, b3)

    out = feedforward_nn(x, params)
    out = jax.block_until_ready(out)
    assert out.shape == (batch, output_dim)
    assert out.dtype == jnp.float32

    # Tight check against a bf16-matched reference (same matmul cast pattern;
    # extra slack for the bf16 output store).
    ref_bf = _ref_bf16(x, w1, b1, w2, b2, w3, b3)
    assert jnp.allclose(out, ref_bf, atol=5e-3, rtol=5e-3)

    # Looser check against the full-f32 PyTorch-equivalent math
    # (bf16 matmul operands / output introduce ~1% relative error).
    ref = jnp.maximum(x @ w1 + b1, 0.0)
    ref = jnp.maximum(ref @ w2 + b2, 0.0)
    ref = ref @ w3 + b3
    assert jnp.allclose(out, ref, atol=2e-2, rtol=2e-2)

    print("KERNEL_OK")
</pallas_src>

<mosaic_0001>
module attributes {stable_mosaic.version = 11 : i64} {
  func.func @_mlp_kernel(%arg0: i32, %arg1: memref<512x16xf32, #tpu.memory_space<vmem>>, %arg2: memref<16x32xbf16, #tpu.memory_space<vmem>>, %arg3: memref<1x32xf32, #tpu.memory_space<vmem>>, %arg4: memref<32x32xbf16, #tpu.memory_space<vmem>>, %arg5: memref<1x32xf32, #tpu.memory_space<vmem>>, %arg6: memref<32x128xbf16, #tpu.memory_space<vmem>>, %arg7: memref<1x128xf32, #tpu.memory_space<vmem>>, %arg8: memref<512x128xbf16, #tpu.memory_space<vmem>>) attributes {dimension_semantics = [#tpu.dimension_semantics<parallel>], iteration_bounds = array<i64: 1>, scalar_prefetch = 0 : i64, scratch_operands = 0 : i64, tpu.core_type = #tpu.core_type<tc>, window_params = [{transform_indices = @transform_0, window_bounds = array<i64: 512, 16>}, {pipeline_mode = #tpu.pipeline_mode<synchronous>, transform_indices = @transform_1, window_bounds = array<i64: 16, 32>}, {pipeline_mode = #tpu.pipeline_mode<synchronous>, transform_indices = @transform_2, window_bounds = array<i64: 1, 32>}, {pipeline_mode = #tpu.pipeline_mode<synchronous>, transform_indices = @transform_3, window_bounds = array<i64: 32, 32>}, {pipeline_mode = #tpu.pipeline_mode<synchronous>, transform_indices = @transform_4, window_bounds = array<i64: 1, 32>}, {pipeline_mode = #tpu.pipeline_mode<synchronous>, transform_indices = @transform_5, window_bounds = array<i64: 32, 128>}, {pipeline_mode = #tpu.pipeline_mode<synchronous>, transform_indices = @transform_6, window_bounds = array<i64: 1, 128>}, {transform_indices = @transform_7, window_bounds = array<i64: 512, 128>}]} {
    %c0 = arith.constant 0 : index
    %c0_0 = arith.constant 0 : index
    %0 = vector.load %arg1[%c0, %c0_0] : memref<512x16xf32, #tpu.memory_space<vmem>>, vector<512x16xf32>
    %1 = arith.truncf %0 : vector<512x16xf32> to vector<512x16xbf16>
    %c0_1 = arith.constant 0 : index
    %c0_2 = arith.constant 0 : index
    %2 = vector.load %arg2[%c0_1, %c0_2] : memref<16x32xbf16, #tpu.memory_space<vmem>>, vector<16x32xbf16>
    %cst = arith.constant dense<0.000000e+00> : vector<512x32xf32>
    %3 = tpu.matmul %1, %2, %cst {dimension_numbers = #tpu.dot_dimension_numbers<[1], [0], [0], [1], [0, 0, 1, 1], [], []>} : vector<512x16xbf16>, vector<16x32xbf16>, vector<512x32xf32> -> vector<512x32xf32>
    %c0_3 = arith.constant 0 : index
    %c0_4 = arith.constant 0 : index
    %4 = vector.load %arg3[%c0_3, %c0_4] : memref<1x32xf32, #tpu.memory_space<vmem>>, vector<1x32xf32>
    %5 = vector.broadcast %4 : vector<1x32xf32> to vector<512x32xf32>
    %6 = arith.addf %3, %5 : vector<512x32xf32>
    %cst_5 = arith.constant 0.000000e+00 : f32
    %7 = vector.broadcast %cst_5 : f32 to vector<512x32xf32>
    %8 = arith.maximumf %6, %7 : vector<512x32xf32>
    %9 = arith.truncf %8 : vector<512x32xf32> to vector<512x32xbf16>
    %c0_6 = arith.constant 0 : index
    %c0_7 = arith.constant 0 : index
    %10 = vector.load %arg4[%c0_6, %c0_7] : memref<32x32xbf16, #tpu.memory_space<vmem>>, vector<32x32xbf16>
    %cst_8 = arith.constant dense<0.000000e+00> : vector<512x32xf32>
    %11 = tpu.matmul %9, %10, %cst_8 {dimension_numbers = #tpu.dot_dimension_numbers<[1], [0], [0], [1], [0, 0, 1, 1], [], []>} : vector<512x32xbf16>, vector<32x32xbf16>, vector<512x32xf32> -> vector<512x32xf32>
    %c0_9 = arith.constant 0 : index
    %c0_10 = arith.constant 0 : index
    %12 = vector.load %arg5[%c0_9, %c0_10] : memref<1x32xf32, #tpu.memory_space<vmem>>, vector<1x32xf32>
    %13 = vector.broadcast %12 : vector<1x32xf32> to vector<512x32xf32>
    %14 = arith.addf %11, %13 : vector<512x32xf32>
    %cst_11 = arith.constant 0.000000e+00 : f32
    %15 = vector.broadcast %cst_11 : f32 to vector<512x32xf32>
    %16 = arith.maximumf %14, %15 : vector<512x32xf32>
    %17 = arith.truncf %16 : vector<512x32xf32> to vector<512x32xbf16>
    %c0_12 = arith.constant 0 : index
    %c0_13 = arith.constant 0 : index
    %18 = vector.load %arg6[%c0_12, %c0_13] : memref<32x128xbf16, #tpu.memory_space<vmem>>, vector<32x128xbf16>
    %cst_14 = arith.constant dense<0.000000e+00> : vector<512x128xf32>
    %19 = tpu.matmul %17, %18, %cst_14 {dimension_numbers = #tpu.dot_dimension_numbers<[1], [0], [0], [1], [0, 0, 1, 1], [], []>} : vector<512x32xbf16>, vector<32x128xbf16>, vector<512x128xf32> -> vector<512x128xf32>
    %c0_15 = arith.constant 0 : index
    %c0_16 = arith.constant 0 : index
    %20 = vector.load %arg7[%c0_15, %c0_16] : memref<1x128xf32, #tpu.memory_space<vmem>>, vector<1x128xf32>
    %21 = vector.broadcast %20 : vector<1x128xf32> to vector<512x128xf32>
    %22 = arith.addf %19, %21 : vector<512x128xf32>
    %23 = arith.truncf %22 : vector<512x128xf32> to vector<512x128xbf16>
    %c0_17 = arith.constant 0 : index
    %c0_18 = arith.constant 0 : index
    %24 = vector.load %arg8[%c0_17, %c0_18] : memref<512x128xbf16, #tpu.memory_space<vmem>>, vector<512x128xbf16>
    tpu.vector_store %arg8[%c0_17, %c0_18], %23 {strides = array<i32>} : memref<512x128xbf16, #tpu.memory_space<vmem>>, vector<512x128xbf16>,
    return
  }
  func.func @transform_0(%arg0: i32) -> (i32, i32) {
    %c0_i32 = arith.constant 0 : i32
    %c0_i32_0 = arith.constant 0 : i32
    return %arg0, %c0_i32 : i32, i32
  }
  func.func @transform_1(%arg0: i32) -> (i32, i32) {
    %c0_i32 = arith.constant 0 : i32
    %c0_i32_0 = arith.constant 0 : i32
    %c0_i32_1 = arith.constant 0 : i32
    return %c0_i32, %c0_i32_0 : i32, i32
  }
  func.func @transform_2(%arg0: i32) -> (i32, i32) {
    %c0_i32 = arith.constant 0 : i32
    %c0_i32_0 = arith.constant 0 : i32
    %c0_i32_1 = arith.constant 0 : i32
    return %c0_i32, %c0_i32_0 : i32, i32
  }
  func.func @transform_3(%arg0: i32) -> (i32, i32) {
    %c0_i32 = arith.constant 0 : i32
    %c0_i32_0 = arith.constant 0 : i32
    %c0_i32_1 = arith.constant 0 : i32
    return %c0_i32, %c0_i32_0 : i32, i32
  }
  func.func @transform_4(%arg0: i32) -> (i32, i32) {
    %c0_i32 = arith.constant 0 : i32
    %c0_i32_0 = arith.constant 0 : i32
    %c0_i32_1 = arith.constant 0 : i32
    return %c0_i32, %c0_i32_0 : i32, i32
  }
  func.func @transform_5(%arg0: i32) -> (i32, i32) {
    %c0_i32 = arith.constant 0 : i32
    %c0_i32_0 = arith.constant 0 : i32
    %c0_i32_1 = arith.constant 0 : i32
    return %c0_i32, %c0_i32_0 : i32, i32
  }
  func.func @transform_6(%arg0: i32) -> (i32, i32) {
    %c0_i32 = arith.constant 0 : i32
    %c0_i32_0 = arith.constant 0 : i32
    %c0_i32_1 = arith.constant 0 : i32
    return %c0_i32, %c0_i32_0 : i32, i32
  }
  func.func @transform_7(%arg0: i32) -> (i32, i32) {
    %c0_i32 = arith.constant 0 : i32
    %c0_i32_0 = arith.constant 0 : i32
    return %arg0, %c0_i32 : i32, i32
  }
}

</mosaic_0001>

<bundles_post_ra>
// kernel: tpu_custom_call.1
= control target key start
LH: loop header
LB: loop body
LE: loop exit
PB: predicated region body
PF: predicated region fallthrough
CT: control target
= control target key end

     0   :  { %vm139_vm0 = vcmask 130048   ;;  %s3225_s0 = inlined_call_operand.vmem [shape: f32[512,16], index: 0, kind: input, shape index: {}]   ;;  %s3226_s1 = inlined_call_operand.vmem [shape: bf16[16,32], index: 1, kind: input, shape index: {}]   ;;  %s3227_s2 = inlined_call_operand.vmem [shape: f32[1,32], index: 2, kind: input, shape index: {}]   ;;  %s3228_s3 = inlined_call_operand.vmem [shape: bf16[32,32], index: 3, kind: input, shape index: {}]   ;;  %s3229_s4 = inlined_call_operand.vmem [shape: f32[1,32], index: 4, kind: input, shape index: {}]   ;;  %s3230_s5 = inlined_call_operand.vmem [shape: bf16[32,128], index: 5, kind: input, shape index: {}]   ;;  %s3231_s6 = inlined_call_operand.vmem [shape: f32[1,128], index: 6, kind: input, shape index: {}]   ;;  %s3232_s7 = inlined_call_operand.hbm [shape: bf16[512,128], index: 7, kind: output, shape index: {}]  }
   0x1   :  { %v2601_v0 = vld [vmem:[%s3226_s1] sm:$0xff]   ;;  %v29_v2 = vld [vmem:[%s3225_s0 + $0x8] sm:$0xff]  ;;  %v30_v3 = vld [vmem:[%s3225_s0 + $0x10] sm:$0xff] }
   0x2   :  { %v28_v1 = vld [vmem:[%s3225_s0] sm:$0xff]  ;;  %2394 = vmatprep.subr.bf16.mxu0 %v2601_v0  ;;  %v31_v5 = vld [vmem:[%s3225_s0 + $0x18] sm:$0xff]  ;;  %v33_v7 = vld [vmem:[%s3225_s0 + $0x28] sm:$0xff]  ;;  %2596 = vmatprep.subr.bf16.mxu1 %v2601_v0 }
   0x3   :  { %v92_v4 = vpack.c.bf16 %v29_v2, %v28_v1  ;;  %v32_v6 = vld [vmem:[%s3225_s0 + $0x20] sm:$0xff]  ;;  %2395 = vmatpush3.bf16.msra.mxu0 %v2601_v0  ;;  %v93_v8 = vpack.c.bf16 %v31_v5, %v30_v3  ;;  %2597 = vmatpush3.bf16.msra.mxu1 %v2601_v0  ;;  %v34_v10 = vld [vmem:[%s3225_s0 + $0x30] sm:$0xff]  ;;  %v35_v11 = vld [vmem:[%s3225_s0 + $0x38] sm:$0xff] }
   0x4   :  { %v94_v9 = vpack.c.bf16 %v33_v7, %v32_v6  ;;  %v36_v12 = vld [vmem:[%s3225_s0 + $0x40] sm:$0xff]  ;;  %v37_v13 = vld [vmem:[%s3225_s0 + $0x48] sm:$0xff]  ;;  %v95_v14 = vpack.c.bf16 %v35_v11, %v34_v10  ;;  %v62_v18 = vld [vmem:[%s3225_s0 + $0x110] sm:$0xff] }
   0x5   :  { %2396 = vmatprep.mubr.msk.bf16.mxu0 %vm139_vm0, %v92_v4  ;;  %v96_v15 = vpack.c.bf16 %v37_v13, %v36_v12  ;;  %v60_v16 = vld [vmem:[%s3225_s0 + $0x100] sm:$0xff]  ;;  %v61_v17 = vld [vmem:[%s3225_s0 + $0x108] sm:$0xff]  ;;  %v63_v19 = vld [vmem:[%s3225_s0 + $0x118] sm:$0xff] }
   0x6   :  { %2397 = vmatmul.mubr.msk.bf16.vlgmr.msra.gmra.mrb[0].mxu0 %vm139_vm0, %v93_v8  ;;  %v108_v20 = vpack.c.bf16 %v61_v17, %v60_v16  ;;  %v109_v21 = vpack.c.bf16 %v63_v19, %v62_v18  ;;  %v64_v22 = vld [vmem:[%s3225_s0 + $0x120] sm:$0xff]  ;;  %v65_v23 = vld [vmem:[%s3225_s0 + $0x128] sm:$0xff]  ;;  %v38_v25 = vld [vmem:[%s3225_s0 + $0x50] sm:$0xff] }
   0x7   :  { %2400 = vmatprep.mubr.msk.bf16.mxu0 %vm139_vm0, %v94_v9  ;;  %v110_v24 = vpack.c.bf16 %v65_v23, %v64_v22  ;;  %v39_v26 = vld [vmem:[%s3225_s0 + $0x58] sm:$0xff]  ;;  %v40_v27 = vld [vmem:[%s3225_s0 + $0x60] sm:$0xff]  ;;  %v41_v28 = vld [vmem:[%s3225_s0 + $0x68] sm:$0xff] }
   0x8   :  { %2428 = vmatprep.mubr.msk.bf16.mxu1 %vm139_vm0, %v108_v20  ;;  %v66_v29 = vld [vmem:[%s3225_s0 + $0x130] sm:$0xff]  ;;  %v67_v30 = vld [vmem:[%s3225_s0 + $0x138] sm:$0xff]  ;;  %v97_v31 = vpack.c.bf16 %v39_v26, %v38_v25  ;;  %v68_v32 = vld [vmem:[%s3225_s0 + $0x140] sm:$0xff]  ;;  %v98_v34 = vpack.c.bf16 %v41_v28, %v40_v27 }
   0x9   :  { %2429 = vmatmul.mubr.msk.bf16.vlgmr.msra.gmra.mrb[0].mxu1 %vm139_vm0, %v109_v21  ;;  %v69_v33 = vld [vmem:[%s3225_s0 + $0x148] sm:$0xff]  ;;  %v111_v35 = vpack.c.bf16 %v67_v30, %v66_v29  ;;  %v42_v36 = vld [vmem:[%s3225_s0 + $0x70] sm:$0xff]  ;;  %v43_v37 = vld [vmem:[%s3225_s0 + $0x78] sm:$0xff] }
   0xa   :  { %2432 = vmatprep.mubr.msk.bf16.mxu1 %vm139_vm0, %v110_v24  ;;  %v112_v38 = vpack.c.bf16 %v69_v33, %v68_v32  ;;  %v44_v39 = vld [vmem:[%s3225_s0 + $0x80] sm:$0xff]  ;;  %v45_v40 = vld [vmem:[%s3225_s0 + $0x88] sm:$0xff]  ;;  %v70_v41 = vld [vmem:[%s3225_s0 + $0x150] sm:$0xff] }
   0xb   :  { %v71_v42 = vld [vmem:[%s3225_s0 + $0x158] sm:$0xff]  ;;  %v2602_v43 = vld [vmem:[%s3228_s3] sm:$0xff]   ;;  %v2603_v44 = vld [vmem:[%s3228_s3 + $0x8] sm:$0xff]  }
   0xc   :  { %2460 = vmatprep.subr.bf16.mxu1 %v2602_v43 }
   0xe   :  { %2401 = vmatmul.mubr.msk.bf16.gmra.mrb[4].mxu0 %vm139_vm0, %v95_v14 }
   0xf   :  { %2404 = vmatprep.mubr.msk.bf16.mxu0 %vm139_vm0, %v96_v15 }
  0x11   :  { %2433 = vmatmul.mubr.msk.bf16.gmra.mrb[4].mxu1 %vm139_vm0, %v111_v35 }
  0x12   :  { %2436 = vmatprep.mubr.msk.bf16.mxu1 %vm139_vm0, %v112_v38 }
  0x16   :  { %2405 = vmatmul.mubr.msk.bf16.gmra.mrb[8].mxu0 %vm139_vm0, %v97_v31 }
  0x17   :  { %2408 = vmatprep.mubr.msk.bf16.mxu0 %vm139_vm0, %v98_v34 }
  0x18   :  { %12 = vsyncpa [#allocation3], 0  ;;  %v99_v45 = vpack.c.bf16 %v43_v37, %v42_v36  ;;  %v72_v46 = vld [vmem:[%s3225_s0 + $0x160] sm:$0xff]  ;;  %v73_v47 = vld [vmem:[%s3225_s0 + $0x168] sm:$0xff]  ;;  %2461 = vmatpush3.bf16.msra.mxu1 %v2602_v43  ;;  %v100_v48 = vpack.c.bf16 %v45_v40, %v44_v39  ;;  %v113_v49 = vpack.c.bf16 %v71_v42, %v70_v41  ;;  %vm644_vm1 = vcmask 261120  }
  0x19   :  { %2462 = vmatprep.subr.bf16.mxu1 %v2603_v44  ;;  %v114_v50 = vpack.c.bf16 %v73_v47, %v72_v46  ;;  %v46_v51 = vld [vmem:[%s3225_s0 + $0x90] sm:$0xff]  ;;  %v47_v52 = vld [vmem:[%s3225_s0 + $0x98] sm:$0xff]  ;;  %v48_v53 = vld [vmem:[%s3225_s0 + $0xa0] sm:$0xff] }
  0x1a   :  { %v49_v54 = vld [vmem:[%s3225_s0 + $0xa8] sm:$0xff]  ;;  %2437 = vmatmul.mubr.msk.bf16.gmra.mrb[8].mxu1 %vm139_vm0, %v113_v49  ;;  %v74_v55 = vld [vmem:[%s3225_s0 + $0x170] sm:$0xff]  ;;  %v75_v56 = vld [vmem:[%s3225_s0 + $0x178] sm:$0xff]  ;;  %v101_v57 = vpack.c.bf16 %v47_v52, %v46_v51 }
  0x1b   :  { %2440 = vmatprep.mubr.msk.bf16.mxu1 %vm139_vm0, %v114_v50  ;;  %v76_v58 = vld [vmem:[%s3225_s0 + $0x180] sm:$0xff]  ;;  %v77_v59 = vld [vmem:[%s3225_s0 + $0x188] sm:$0xff]  ;;  %v102_v60 = vpack.c.bf16 %v49_v54, %v48_v53  ;;  %v115_v61 = vpack.c.bf16 %v75_v56, %v74_v55  ;;  %v50_v63 = vld [vmem:[%s3225_s0 + $0xb0] sm:$0xff] }
  0x1c   :  { %2463 = vmatpush3.bf16.msra.mxu1 %v2603_v44  ;;  %v116_v62 = vpack.c.bf16 %v77_v59, %v76_v58  ;;  %v51_v0 = vld [vmem:[%s3225_s0 + $0xb8] sm:$0xff]  ;;  %v52_v1 = vld [vmem:[%s3225_s0 + $0xc0] sm:$0xff]  ;;  %v53_v2 = vld [vmem:[%s3225_s0 + $0xc8] sm:$0xff] }
  0x1d   :  { %v78_v3 = vld [vmem:[%s3225_s0 + $0x190] sm:$0xff]  ;;  %v79_v4 = vld [vmem:[%s3225_s0 + $0x198] sm:$0xff]  ;;  %v103_v5 = vpack.c.bf16 %v51_v0, %v50_v63  ;;  %v80_v6 = vld [vmem:[%s3225_s0 + $0x1a0] sm:$0xff]  ;;  %v104_v8 = vpack.c.bf16 %v53_v2, %v52_v1 }
  0x1e   :  { %2409 = vmatmul.mubr.msk.bf16.gmra.mrb[12].mxu0 %vm139_vm0, %v99_v45  ;;  %v81_v7 = vld [vmem:[%s3225_s0 + $0x1a8] sm:$0xff]  ;;  %v117_v9 = vpack.c.bf16 %v79_v4, %v78_v3  ;;  %v54_v11 = vld [vmem:[%s3225_s0 + $0xd0] sm:$0xff]  ;;  %v55_v12 = vld [vmem:[%s3225_s0 + $0xd8] sm:$0xff] }
  0x1f   :  { %2412 = vmatprep.mubr.msk.bf16.mxu0 %vm139_vm0, %v100_v48  ;;  %v118_v10 = vpack.c.bf16 %v81_v7, %v80_v6  ;;  %v56_v13 = vld [vmem:[%s3225_s0 + $0xe0] sm:$0xff]  ;;  %v57_v14 = vld [vmem:[%s3225_s0 + $0xe8] sm:$0xff]  ;;  %v82_v15 = vld [vmem:[%s3225_s0 + $0x1b0] sm:$0xff]  ;;  %v105_v17 = vpack.c.bf16 %v55_v12, %v54_v11 }
  0x20   :  { %v83_v16 = vld [vmem:[%s3225_s0 + $0x1b8] sm:$0xff]  ;;  %v84_v18 = vld [vmem:[%s3225_s0 + $0x1c0] sm:$0xff]  ;;  %v85_v19 = vld [vmem:[%s3225_s0 + $0x1c8] sm:$0xff]  ;;  %v106_v20 = vpack.c.bf16 %v57_v14, %v56_v13 }
  0x21   :  { %v119_v21 = vpack.c.bf16 %v83_v16, %v82_v15  ;;  %v120_v22 = vpack.c.bf16 %v85_v19, %v84_v18  ;;  %v58_v23 = vld [vmem:[%s3225_s0 + $0xf0] sm:$0xff]  ;;  %v59_v24 = vld [vmem:[%s3225_s0 + $0xf8] sm:$0xff]  ;;  %v88_v28 = vld [vmem:[%s3225_s0 + $0x1e0] sm:$0xff] }
  0x22   :  { %2441 = vmatmul.mubr.msk.bf16.gmra.mrb[12].mxu1 %vm139_vm0, %v115_v61  ;;  %v86_v25 = vld [vmem:[%s3225_s0 + $0x1d0] sm:$0xff]  ;;  %v87_v26 = vld [vmem:[%s3225_s0 + $0x1d8] sm:$0xff]  ;;  %v107_v27 = vpack.c.bf16 %v59_v24, %v58_v23  ;;  %v89_v29 = vld [vmem:[%s3225_s0 + $0x1e8] sm:$0xff] }
  0x23   :  { %2444 = vmatprep.mubr.msk.bf16.mxu1 %vm139_vm0, %v116_v62  ;;  %v121_v30 = vpack.c.bf16 %v87_v26, %v86_v25  ;;  %v122_v31 = vpack.c.bf16 %v89_v29, %v88_v28  ;;  %v90_v32 = vld [vmem:[%s3225_s0 + $0x1f0] sm:$0xff]  ;;  %v91_v33 = vld [vmem:[%s3225_s0 + $0x1f8] sm:$0xff]  ;;  %v2909_v35 = vld [vmem:[%s3227_s2] ss:$0 sm:$0xff] }
  0x24   :  { %v123_v34 = vpack.c.bf16 %v91_v33, %v90_v32  ;;  %v2604_v43 = vld [vmem:[%s3230_s5] sm:$0xff]   ;;  %v2605_v44 = vld [vmem:[%s3230_s5 + $0x8] sm:$0xff]  }
  0x25   :  { %2528 = vmatprep.subr.bf16.mxu0 %v2604_v43 }
  0x26   :  { %2413 = vmatmul.mubr.msk.bf16.gmra.mrb[16].mxu0 %vm139_vm0, %v101_v57 }
  0x27   :  { %2416 = vmatprep.mubr.msk.bf16.mxu0 %vm139_vm0, %v102_v60  ;;  %2529 = vmatpush3.bf16.msra.mxu0 %v2604_v43 }
  0x28   :  { %2530 = vmatprep.subr.bf16.mxu0 %v2605_v44 }
  0x2a   :  { %2445 = vmatmul.mubr.msk.bf16.gmra.mrb[16].mxu1 %vm139_vm0, %v117_v9 }
  0x2b   :  { %2448 = vmatprep.mubr.msk.bf16.mxu1 %vm139_vm0, %v118_v10  ;;  %2531 = vmatpush3.bf16.msra.mxu0 %v2605_v44 }
  0x2e   :  { %2417 = vmatmul.mubr.msk.bf16.gmra.mrb[20].mxu0 %vm139_vm0, %v103_v5 }
  0x2f   :  { %2420 = vmatprep.mubr.msk.bf16.mxu0 %vm139_vm0, %v104_v8 }
  0x32   :  { %2449 = vmatmul.mubr.msk.bf16.gmra.mrb[20].mxu1 %vm139_vm0, %v119_v21 }
  0x33   :  { %2452 = vmatprep.mubr.msk.bf16.mxu1 %vm139_vm0, %v120_v22 }
  0x36   :  { %2421 = vmatmul.mubr.msk.bf16.gmra.mrb[24].mxu0 %vm139_vm0, %v105_v17 }
  0x37   :  { %2424 = vmatprep.mubr.msk.bf16.mxu0 %vm139_vm0, %v106_v20 }
  0x3a   :  { %2453 = vmatmul.mubr.msk.bf16.gmra.mrb[24].mxu1 %vm139_vm0, %v121_v30 }
  0x3b   :  { %2456 = vmatprep.mubr.msk.bf16.mxu1 %vm139_vm0, %v122_v31 }
  0x3e   :  { %2425 = vmatmul.mubr.msk.bf16.gmra.mrb[28].mxu0 %vm139_vm0, %v107_v27 }
  0x42   :  { %2457 = vmatmul.mubr.msk.bf16.gmra.mrb[28].mxu1 %vm139_vm0, %v123_v34 }
  0xd9   :  { %v2398_v36 = vpop.f32.mrb[0].mxu0 }
  0xda   :  { %v279_v37 = vadd.f32 %v2398_v36, %v2909_v35  ;;  %v270_v38 = vpop.f32.mrb[1].mxu0 }
  0xdb   :  { %v271_v39 = vadd.f32 %v2909_v35, %v270_v38  ;;  %v2399_v40 = vpop.f32.mrb[2].mxu0 }
  0xdc   :  { %v282_v41 = vadd.f32 %v2399_v40, %v2909_v35  ;;  %v273_v42 = vpop.f32.mrb[3].mxu0  ;;  %v527_v46 = vmax.f32 %v279_v37, 0.0  ;;  %v2430_v57 = vpop.f32.mrb[0].mxu1 }
  0xdd   :  { %v274_v45 = vadd.f32 %v2909_v35, %v273_v42  ;;  %v525_v48 = vmax.f32 %v271_v39, 0.0  ;;  %v407_v60 = vadd.f32 %v2430_v57, %v2909_v35  ;;  %v398_v61 = vpop.f32.mrb[1].mxu1 }
  0xde   :  { %v528_v47 = vmax.f32 %v282_v41, 0.0  ;;  %v399_v63 = vadd.f32 %v2909_v35, %v398_v61  ;;  %v2431_v0 = vpop.f32.mrb[2].mxu1 }
  0xdf   :  { %v526_v49 = vmax.f32 %v274_v45, 0.0  ;;  %v559_v3 = vmax.f32 %v407_v60, 0.0  ;;  %v410_v4 = vadd.f32 %v2431_v0, %v2909_v35  ;;  %v401_v5 = vpop.f32.mrb[3].mxu1 }
  0xe0   :  { %v590_v50 = vpack.c.bf16 %v528_v47, %v527_v46  ;;  %v557_v8 = vmax.f32 %v399_v63, 0.0  ;;  %v402_v9 = vadd.f32 %v2909_v35, %v401_v5 }
  0xe1   :  { %v589_v51 = vpack.c.bf16 %v526_v49, %v525_v48  ;;  %v2402_v52 = vpop.f32.mrb[4].mxu0  ;;  %v560_v11 = vmax.f32 %v410_v4, 0.0 }
  0xe2   :  { %v295_v53 = vadd.f32 %v2402_v52, %v2909_v35  ;;  %v286_v54 = vpop.f32.mrb[5].mxu0  ;;  %v558_v14 = vmax.f32 %v402_v9, 0.0 }
  0xe3   :  { %v287_v55 = vadd.f32 %v2909_v35, %v286_v54  ;;  %v2403_v56 = vpop.f32.mrb[6].mxu0  ;;  %2464 = vmatprep.mubr.msk.bf16.mxu1 %vm644_vm1, %v589_v51  ;;  %v2932_v17 = vpack.c.bf16 %v560_v11, %v559_v3 }
  0xe4   :  { %v298_v58 = vadd.f32 %v2403_v56, %v2909_v35  ;;  %v289_v59 = vpop.f32.mrb[7].mxu0  ;;  %2465 = vmatmul.mubr.msk.bf16.vlgmr.msra.gmra.mrb[32].mxu1 %vm644_vm1, %v590_v50  ;;  %v531_v1 = vmax.f32 %v295_v53, 0.0  ;;  %v2936_v20 = vpack.c.bf16 %v558_v14, %v557_v8  ;;  %v2434_v21 = vpop.f32.mrb[4].mxu1 }
  0xe5   :  { %v290_v62 = vadd.f32 %v2909_v35, %v289_v59  ;;  %v529_v6 = vmax.f32 %v287_v55, 0.0  ;;  %v423_v24 = vadd.f32 %v2434_v21, %v2909_v35  ;;  %v414_v25 = vpop.f32.mrb[5].mxu1 }
  0xe6   :  { %v532_v2 = vmax.f32 %v298_v58, 0.0  ;;  %v415_v27 = vadd.f32 %v2909_v35, %v414_v25  ;;  %v2435_v28 = vpop.f32.mrb[6].mxu1 }
  0xe7   :  { %v530_v7 = vmax.f32 %v290_v62, 0.0  ;;  %v563_v31 = vmax.f32 %v423_v24, 0.0  ;;  %v426_v32 = vadd.f32 %v2435_v28, %v2909_v35  ;;  %v417_v33 = vpop.f32.mrb[7].mxu1 }
  0xe8   :  { %v592_v10 = vpack.c.bf16 %v532_v2, %v531_v1  ;;  %v561_v37 = vmax.f32 %v415_v27, 0.0  ;;  %v418_v38 = vadd.f32 %v2909_v35, %v417_v33 }
  0xe9   :  { %v591_v12 = vpack.c.bf16 %v530_v7, %v529_v6  ;;  %v2406_v13 = vpop.f32.mrb[8].mxu0  ;;  %v564_v40 = vmax.f32 %v426_v32, 0.0 }
  0xea   :  { %v311_v15 = vadd.f32 %v2406_v13, %v2909_v35  ;;  %v302_v16 = vpop.f32.mrb[9].mxu0  ;;  %v562_v43 = vmax.f32 %v418_v38, 0.0 }
  0xeb   :  { %v303_v18 = vadd.f32 %v2909_v35, %v302_v16  ;;  %v2407_v19 = vpop.f32.mrb[10].mxu0  ;;  %2468 = vmatprep.mubr.msk.bf16.mxu1 %vm644_vm1, %v591_v12  ;;  %v2946_v46 = vpack.c.bf16 %v564_v40, %v563_v31 }
  0xec   :  { %v314_v22 = vadd.f32 %v2407_v19, %v2909_v35  ;;  %v305_v23 = vpop.f32.mrb[11].mxu0  ;;  %2469 = vmatmul.mubr.msk.bf16.gmra.mrb[36].mxu1 %vm644_vm1, %v592_v10  ;;  %v535_v29 = vmax.f32 %v311_v15, 0.0  ;;  %v2950_v49 = vpack.c.bf16 %v562_v43, %v561_v37 }
  0xed   :  { %v306_v26 = vadd.f32 %v2909_v35, %v305_v23  ;;  %v533_v34 = vmax.f32 %v303_v18, 0.0  ;;  %v2438_v50 = vpop.f32.mrb[8].mxu1 }
  0xee   :  { %v536_v30 = vmax.f32 %v314_v22, 0.0  ;;  %v439_v53 = vadd.f32 %v2438_v50, %v2909_v35  ;;  %v430_v54 = vpop.f32.mrb[9].mxu1 }
  0xef   :  { %v534_v36 = vmax.f32 %v306_v26, 0.0  ;;  %v431_v56 = vadd.f32 %v2909_v35, %v430_v54  ;;  %v2439_v57 = vpop.f32.mrb[10].mxu1 }
  0xf0   :  { %v594_v39 = vpack.c.bf16 %v536_v30, %v535_v29  ;;  %v567_v60 = vmax.f32 %v439_v53, 0.0  ;;  %v442_v61 = vadd.f32 %v2439_v57, %v2909_v35  ;;  %v433_v62 = vpop.f32.mrb[11].mxu1 }
  0xf1   :  { %v593_v41 = vpack.c.bf16 %v534_v36, %v533_v34  ;;  %v2410_v42 = vpop.f32.mrb[12].mxu0  ;;  %v565_v1 = vmax.f32 %v431_v56, 0.0  ;;  %v434_v2 = vadd.f32 %v2909_v35, %v433_v62 }
  0xf2   :  { %v327_v44 = vadd.f32 %v2410_v42, %v2909_v35  ;;  %v318_v45 = vpop.f32.mrb[13].mxu0  ;;  %v568_v4 = vmax.f32 %v442_v61, 0.0 }
  0xf3   :  { %v319_v47 = vadd.f32 %v2909_v35, %v318_v45  ;;  %v2411_v48 = vpop.f32.mrb[14].mxu0  ;;  %2472 = vmatprep.mubr.msk.bf16.mxu1 %vm644_vm1, %v593_v41  ;;  %v566_v7 = vmax.f32 %v434_v2, 0.0 }
  0xf4   :  { %v330_v51 = vadd.f32 %v2411_v48, %v2909_v35  ;;  %v321_v52 = vpop.f32.mrb[15].mxu0  ;;  %2473 = vmatmul.mubr.msk.bf16.gmra.mrb[40].mxu1 %vm644_vm1, %v594_v39  ;;  %v539_v58 = vmax.f32 %v327_v44, 0.0  ;;  %v2960_v10 = vpack.c.bf16 %v568_v4, %v567_v60 }
  0xf5   :  { %v322_v55 = vadd.f32 %v2909_v35, %v321_v52  ;;  %v537_v63 = vmax.f32 %v319_v47, 0.0  ;;  %v2964_v13 = vpack.c.bf16 %v566_v7, %v565_v1  ;;  %v2442_v14 = vpop.f32.mrb[12].mxu1 }
  0xf6   :  { %v540_v59 = vmax.f32 %v330_v51, 0.0  ;;  %v455_v18 = vadd.f32 %v2442_v14, %v2909_v35  ;;  %v446_v19 = vpop.f32.mrb[13].mxu1 }
  0xf7   :  { %v538_v0 = vmax.f32 %v322_v55, 0.0  ;;  %v447_v22 = vadd.f32 %v2909_v35, %v446_v19  ;;  %v2443_v23 = vpop.f32.mrb[14].mxu1 }
  0xf8   :  { %v596_v3 = vpack.c.bf16 %v540_v59, %v539_v58  ;;  %v571_v26 = vmax.f32 %v455_v18, 0.0  ;;  %v458_v27 = vadd.f32 %v2443_v23, %v2909_v35  ;;  %v449_v28 = vpop.f32.mrb[15].mxu1 }
  0xf9   :  { %v595_v5 = vpack.c.bf16 %v538_v0, %v537_v63  ;;  %v2414_v6 = vpop.f32.mrb[16].mxu0  ;;  %v569_v31 = vmax.f32 %v447_v22, 0.0  ;;  %v450_v32 = vadd.f32 %v2909_v35, %v449_v28 }
  0xfa   :  { %v343_v8 = vadd.f32 %v2414_v6, %v2909_v35  ;;  %v334_v9 = vpop.f32.mrb[17].mxu0  ;;  %v572_v34 = vmax.f32 %v458_v27, 0.0 }
  0xfb   :  { %v335_v11 = vadd.f32 %v2909_v35, %v334_v9  ;;  %v2415_v12 = vpop.f32.mrb[18].mxu0  ;;  %2476 = vmatprep.mubr.msk.bf16.mxu1 %vm644_vm1, %v595_v5  ;;  %v570_v38 = vmax.f32 %v450_v32, 0.0 }
  0xfc   :  { %v346_v15 = vadd.f32 %v2415_v12, %v2909_v35  ;;  %v337_v16 = vpop.f32.mrb[19].mxu0  ;;  %2477 = vmatmul.mubr.msk.bf16.gmra.mrb[44].mxu1 %vm644_vm1, %v596_v3  ;;  %v543_v24 = vmax.f32 %v343_v8, 0.0  ;;  %v2974_v41 = vpack.c.bf16 %v572_v34, %v571_v26 }
  0xfd   :  { %v338_v21 = vadd.f32 %v2909_v35, %v337_v16  ;;  %v541_v29 = vmax.f32 %v335_v11, 0.0  ;;  %v2978_v44 = vpack.c.bf16 %v570_v38, %v569_v31  ;;  %v2446_v45 = vpop.f32.mrb[16].mxu1 }
  0xfe   :  { %v544_v25 = vmax.f32 %v346_v15, 0.0  ;;  %v471_v50 = vadd.f32 %v2446_v45, %v2909_v35  ;;  %v462_v51 = vpop.f32.mrb[17].mxu1 }
  0xff   :  { %v542_v30 = vmax.f32 %v338_v21, 0.0  ;;  %v463_v53 = vadd.f32 %v2909_v35, %v462_v51  ;;  %v2447_v54 = vpop.f32.mrb[18].mxu1 }
 0x100   :  { %v598_v33 = vpack.c.bf16 %v544_v25, %v543_v24  ;;  %v575_v57 = vmax.f32 %v471_v50, 0.0  ;;  %v474_v58 = vadd.f32 %v2447_v54, %v2909_v35  ;;  %v465_v59 = vpop.f32.mrb[19].mxu1 }
 0x101   :  { %v597_v36 = vpack.c.bf16 %v542_v30, %v541_v29  ;;  %v2418_v37 = vpop.f32.mrb[20].mxu0  ;;  %v573_v62 = vmax.f32 %v463_v53, 0.0  ;;  %v466_v63 = vadd.f32 %v2909_v35, %v465_v59 }
 0x102   :  { %v359_v39 = vadd.f32 %v2418_v37, %v2909_v35  ;;  %v350_v40 = vpop.f32.mrb[21].mxu0  ;;  %v576_v1 = vmax.f32 %v474_v58, 0.0 }
 0x103   :  { %v351_v42 = vadd.f32 %v2909_v35, %v350_v40  ;;  %v2419_v43 = vpop.f32.mrb[22].mxu0  ;;  %2480 = vmatprep.mubr.msk.bf16.mxu1 %vm644_vm1, %v597_v36  ;;  %v574_v4 = vmax.f32 %v466_v63, 0.0 }
 0x104   :  { %v362_v47 = vadd.f32 %v2419_v43, %v2909_v35  ;;  %v353_v48 = vpop.f32.mrb[23].mxu0  ;;  %2481 = vmatmul.mubr.msk.bf16.gmra.mrb[48].mxu1 %vm644_vm1, %v598_v33  ;;  %v547_v55 = vmax.f32 %v359_v39, 0.0  ;;  %v2988_v7 = vpack.c.bf16 %v576_v1, %v575_v57 }
 0x105   :  { %v354_v52 = vadd.f32 %v2909_v35, %v353_v48  ;;  %v545_v60 = vmax.f32 %v351_v42, 0.0  ;;  %v2992_v11 = vpack.c.bf16 %v574_v4, %v573_v62  ;;  %v2450_v12 = vpop.f32.mrb[20].mxu1 }
 0x106   :  { %v548_v56 = vmax.f32 %v362_v47, 0.0  ;;  %v487_v16 = vadd.f32 %v2450_v12, %v2909_v35  ;;  %v478_v18 = vpop.f32.mrb[21].mxu1 }
 0x107   :  { %v546_v61 = vmax.f32 %v354_v52, 0.0  ;;  %v479_v21 = vadd.f32 %v2909_v35, %v478_v18  ;;  %v2451_v22 = vpop.f32.mrb[22].mxu1 }
 0x108   :  { %v600_v0 = vpack.c.bf16 %v548_v56, %v547_v55  ;;  %v579_v25 = vmax.f32 %v487_v16, 0.0  ;;  %v490_v26 = vadd.f32 %v2451_v22, %v2909_v35  ;;  %v481_v27 = vpop.f32.mrb[23].mxu1 }
 0x109   :  { %v599_v2 = vpack.c.bf16 %v546_v61, %v545_v60  ;;  %v2422_v3 = vpop.f32.mrb[24].mxu0  ;;  %v577_v30 = vmax.f32 %v479_v21, 0.0  ;;  %v482_v31 = vadd.f32 %v2909_v35, %v481_v27 }
 0x10a   :  { %v375_v5 = vadd.f32 %v2422_v3, %v2909_v35  ;;  %v366_v6 = vpop.f32.mrb[25].mxu0  ;;  %v580_v33 = vmax.f32 %v490_v26, 0.0 }
 0x10b   :  { %v367_v8 = vadd.f32 %v2909_v35, %v366_v6  ;;  %v2423_v9 = vpop.f32.mrb[26].mxu0  ;;  %2484 = vmatprep.mubr.msk.bf16.mxu1 %vm644_vm1, %v599_v2  ;;  %v578_v37 = vmax.f32 %v482_v31, 0.0 }
 0x10c   :  { %v378_v14 = vadd.f32 %v2423_v9, %v2909_v35  ;;  %v369_v15 = vpop.f32.mrb[27].mxu0  ;;  %2485 = vmatmul.mubr.msk.bf16.gmra.mrb[52].mxu1 %vm644_vm1, %v600_v0  ;;  %v551_v23 = vmax.f32 %v375_v5, 0.0  ;;  %v616_v40 = vpack.c.bf16 %v580_v33, %v579_v25 }
 0x10d   :  { %v370_v19 = vadd.f32 %v2909_v35, %v369_v15  ;;  %v549_v28 = vmax.f32 %v367_v8, 0.0  ;;  %v615_v45 = vpack.c.bf16 %v578_v37, %v577_v30  ;;  %v2454_v47 = vpop.f32.mrb[24].mxu1 }
 0x10e   :  { %v552_v24 = vmax.f32 %v378_v14, 0.0  ;;  %v503_v51 = vadd.f32 %v2454_v47, %v2909_v35  ;;  %v494_v52 = vpop.f32.mrb[25].mxu1 }
 0x10f   :  { %v550_v29 = vmax.f32 %v370_v19, 0.0  ;;  %v495_v54 = vadd.f32 %v2909_v35, %v494_v52  ;;  %v2455_v55 = vpop.f32.mrb[26].mxu1 }
 0x110   :  { %v602_v32 = vpack.c.bf16 %v552_v24, %v551_v23  ;;  %v583_v58 = vmax.f32 %v503_v51, 0.0  ;;  %v506_v59 = vadd.f32 %v2455_v55, %v2909_v35  ;;  %v497_v60 = vpop.f32.mrb[27].mxu1 }
 0x111   :  { %v601_v34 = vpack.c.bf16 %v550_v29, %v549_v28  ;;  %v2426_v36 = vpop.f32.mrb[28].mxu0  ;;  %v581_v63 = vmax.f32 %v495_v54, 0.0  ;;  %v498_v0 = vadd.f32 %v2909_v35, %v497_v60 }
 0x112   :  { %v391_v38 = vadd.f32 %v2426_v36, %v2909_v35  ;;  %v382_v39 = vpop.f32.mrb[29].mxu0  ;;  %v584_v2 = vmax.f32 %v506_v59, 0.0 }
 0x113   :  { %v383_v42 = vadd.f32 %v2909_v35, %v382_v39  ;;  %v2427_v43 = vpop.f32.mrb[30].mxu0  ;;  %2488 = vmatprep.mubr.msk.bf16.mxu1 %vm644_vm1, %v601_v34  ;;  %v582_v4 = vmax.f32 %v498_v0, 0.0 }
 0x114   :  { %v394_v48 = vadd.f32 %v2427_v43, %v2909_v35  ;;  %v385_v50 = vpop.f32.mrb[31].mxu0  ;;  %2489 = vmatmul.mubr.msk.bf16.gmra.mrb[56].mxu1 %vm644_vm1, %v602_v32  ;;  %v555_v56 = vmax.f32 %v391_v38, 0.0  ;;  %v618_v5 = vpack.c.bf16 %v584_v2, %v583_v58 }
 0x115   :  { %v386_v53 = vadd.f32 %v2909_v35, %v385_v50  ;;  %v553_v61 = vmax.f32 %v383_v42, 0.0  ;;  %v617_v6 = vpack.c.bf16 %v582_v4, %v581_v63  ;;  %v2458_v8 = vpop.f32.mrb[28].mxu1 }
 0x116   :  { %v556_v57 = vmax.f32 %v394_v48, 0.0  ;;  %v519_v9 = vadd.f32 %v2458_v8, %v2909_v35  ;;  %v510_v12 = vpop.f32.mrb[29].mxu1 }
 0x117   :  { %v554_v62 = vmax.f32 %v386_v53, 0.0  ;;  %v511_v14 = vadd.f32 %v2909_v35, %v510_v12  ;;  %v2459_v15 = vpop.f32.mrb[30].mxu1 }
 0x118   :  { %v604_v1 = vpack.c.bf16 %v556_v57, %v555_v56  ;;  %v587_v16 = vmax.f32 %v519_v9, 0.0  ;;  %v522_v18 = vadd.f32 %v2459_v15, %v2909_v35  ;;  %v513_v19 = vpop.f32.mrb[31].mxu1 }
 0x119   :  { %v603_v3 = vpack.c.bf16 %v554_v62, %v553_v61  ;;  %v585_v21 = vmax.f32 %v511_v14, 0.0  ;;  %v514_v22 = vadd.f32 %v2909_v35, %v513_v19  ;;  %v3046_v35 = vld [vmem:[%s3229_s4] ss:$0 sm:$0xff] }
 0x11a   :  { %v588_v23 = vmax.f32 %v522_v18, 0.0 }
 0x11b   :  { %2492 = vmatprep.mubr.msk.bf16.mxu1 %vm644_vm1, %v603_v3  ;;  %v586_v24 = vmax.f32 %v514_v22, 0.0 }
 0x11c   :  { %2493 = vmatmul.mubr.msk.bf16.gmra.mrb[60].mxu1 %vm644_vm1, %v604_v1  ;;  %v620_v25 = vpack.c.bf16 %v588_v23, %v587_v16 }
 0x11d   :  { %2496 = vmatprep.mubr.msk.bf16.mxu1 %vm644_vm1, %v2936_v20  ;;  %v619_v26 = vpack.c.bf16 %v586_v24, %v585_v21 }
 0x124   :  { %2497 = vmatmul.mubr.msk.bf16.gmra.mrb[64].mxu1 %vm644_vm1, %v2932_v17 }
 0x125   :  { %2500 = vmatprep.mubr.msk.bf16.mxu1 %vm644_vm1, %v2950_v49 }
 0x12c   :  { %2501 = vmatmul.mubr.msk.bf16.gmra.mrb[68].mxu1 %vm644_vm1, %v2946_v46 }
 0x12d   :  { %2504 = vmatprep.mubr.msk.bf16.mxu1 %vm644_vm1, %v2964_v13 }
 0x134   :  { %2505 = vmatmul.mubr.msk.bf16.gmra.mrb[72].mxu1 %vm644_vm1, %v2960_v10 }
 0x135   :  { %2508 = vmatprep.mubr.msk.bf16.mxu1 %vm644_vm1, %v2978_v44 }
 0x13c   :  { %2509 = vmatmul.mubr.msk.bf16.gmra.mrb[76].mxu1 %vm644_vm1, %v2974_v41 }
 0x13d   :  { %2512 = vmatprep.mubr.msk.bf16.mxu1 %vm644_vm1, %v2992_v11 }
 0x144   :  { %2513 = vmatmul.mubr.msk.bf16.gmra.mrb[80].mxu1 %vm644_vm1, %v2988_v7 }
 0x145   :  { %2516 = vmatprep.mubr.msk.bf16.mxu1 %vm644_vm1, %v615_v45 }
 0x14c   :  { %2517 = vmatmul.mubr.msk.bf16.gmra.mrb[84].mxu1 %vm644_vm1, %v616_v40 }
 0x14d   :  { %2520 = vmatprep.mubr.msk.bf16.mxu1 %vm644_vm1, %v617_v6 }
 0x154   :  { %2521 = vmatmul.mubr.msk.bf16.gmra.mrb[88].mxu1 %vm644_vm1, %v618_v5 }
 0x155   :  { %2524 = vmatprep.mubr.msk.bf16.mxu1 %vm644_vm1, %v619_v26 }
 0x15c   :  { %2525 = vmatmul.mubr.msk.bf16.gmra.mrb[92].mxu1 %vm644_vm1, %v620_v25 }
 0x1b7   :  { %v2466_v17 = vpop.f32.mrb[32].mxu1 }
 0x1b8   :  { %v784_v20 = vadd.f32 %v2466_v17, %v3046_v35  ;;  %v775_v46 = vpop.f32.mrb[33].mxu1 }
 0x1b9   :  { %v776_v49 = vadd.f32 %v3046_v35, %v775_v46  ;;  %v2467_v10 = vpop.f32.mrb[34].mxu1 }
 0x1ba   :  { %v787_v13 = vadd.f32 %v2467_v10, %v3046_v35  ;;  %v778_v41 = vpop.f32.mrb[35].mxu1  ;;  %v1032_v7 = vmax.f32 %v784_v20, 0.0 }
 0x1bb   :  { %v779_v44 = vadd.f32 %v3046_v35, %v778_v41  ;;  %v1030_v27 = vmax.f32 %v776_v49, 0.0 }
 0x1bc   :  { %v1033_v11 = vmax.f32 %v787_v13, 0.0 }
 0x1bd   :  { %v1031_v28 = vmax.f32 %v779_v44, 0.0 }
 0x1be   :  { %v1095_v29 = vpack.c.bf16 %v1033_v11, %v1032_v7 }
 0x1bf   :  { %v1094_v30 = vpack.c.bf16 %v1031_v28, %v1030_v27  ;;  %v2470_v31 = vpop.f32.mrb[36].mxu1 }
 0x1c0   :  { %v800_v32 = vadd.f32 %v2470_v31, %v3046_v35  ;;  %v791_v33 = vpop.f32.mrb[37].mxu1 }
 0x1c1   :  { %v792_v34 = vadd.f32 %v3046_v35, %v791_v33  ;;  %v2471_v36 = vpop.f32.mrb[38].mxu1  ;;  %2532 = vmatprep.mubr.msk.bf16.mxu0 %vm644_vm1, %v1094_v30 }
 0x1c2   :  { %v803_v37 = vadd.f32 %v2471_v36, %v3046_v35  ;;  %v794_v38 = vpop.f32.mrb[39].mxu1  ;;  %2533 = vmatmul.mubr.msk.bf16.vlgmr.msra.gmra.mrb[32].mxu0 %vm644_vm1, %v1095_v29  ;;  %v1036_v40 = vmax.f32 %v800_v32, 0.0 }
 0x1c3   :  { %v795_v39 = vadd.f32 %v3046_v35, %v794_v38  ;;  %v1034_v43 = vmax.f32 %v792_v34, 0.0 }
 0x1c4   :  { %v1037_v42 = vmax.f32 %v803_v37, 0.0 }
 0x1c5   :  { %v1035_v45 = vmax.f32 %v795_v39, 0.0 }
 0x1c6   :  { %v1097_v47 = vpack.c.bf16 %v1037_v42, %v1036_v40 }
 0x1c7   :  { %v1096_v48 = vpack.c.bf16 %v1035_v45, %v1034_v43  ;;  %v2474_v50 = vpop.f32.mrb[40].mxu1 }
 0x1c8   :  { %v816_v51 = vadd.f32 %v2474_v50, %v3046_v35  ;;  %v807_v52 = vpop.f32.mrb[41].mxu1 }
 0x1c9   :  { %v808_v53 = vadd.f32 %v3046_v35, %v807_v52  ;;  %v2475_v54 = vpop.f32.mrb[42].mxu1  ;;  %2536 = vmatprep.mubr.msk.bf16.mxu0 %vm644_vm1, %v1096_v48 }
 0x1ca   :  { %v819_v55 = vadd.f32 %v2475_v54, %v3046_v35  ;;  %v810_v56 = vpop.f32.mrb[43].mxu1  ;;  %2537 = vmatmul.mubr.msk.bf16.gmra.mrb[36].mxu0 %vm644_vm1, %v1097_v47  ;;  %v1040_v58 = vmax.f32 %v816_v51, 0.0 }
 0x1cb   :  { %v811_v57 = vadd.f32 %v3046_v35, %v810_v56  ;;  %v1038_v60 = vmax.f32 %v808_v53, 0.0 }
 0x1cc   :  { %v1041_v59 = vmax.f32 %v819_v55, 0.0 }
 0x1cd   :  { %v1039_v61 = vmax.f32 %v811_v57, 0.0 }
 0x1ce   :  { %v1099_v62 = vpack.c.bf16 %v1041_v59, %v1040_v58 }
 0x1cf   :  { %v1098_v63 = vpack.c.bf16 %v1039_v61, %v1038_v60  ;;  %v2478_v0 = vpop.f32.mrb[44].mxu1 }
 0x1d0   :  { %v832_v1 = vadd.f32 %v2478_v0, %v3046_v35  ;;  %v823_v2 = vpop.f32.mrb[45].mxu1 }
 0x1d1   :  { %v824_v3 = vadd.f32 %v3046_v35, %v823_v2  ;;  %v2479_v4 = vpop.f32.mrb[46].mxu1  ;;  %2540 = vmatprep.mubr.msk.bf16.mxu0 %vm644_vm1, %v1098_v63 }
 0x1d2   :  { %v835_v5 = vadd.f32 %v2479_v4, %v3046_v35  ;;  %v826_v6 = vpop.f32.mrb[47].mxu1  ;;  %2541 = vmatmul.mubr.msk.bf16.gmra.mrb[40].mxu0 %vm644_vm1, %v1099_v62  ;;  %v1044_v9 = vmax.f32 %v832_v1, 0.0 }
 0x1d3   :  { %v827_v8 = vadd.f32 %v3046_v35, %v826_v6  ;;  %v1042_v14 = vmax.f32 %v824_v3, 0.0 }
 0x1d4   :  { %v1045_v12 = vmax.f32 %v835_v5, 0.0 }
 0x1d5   :  { %v1043_v15 = vmax.f32 %v827_v8, 0.0 }
 0x1d6   :  { %v1101_v16 = vpack.c.bf16 %v1045_v12, %v1044_v9 }
 0x1d7   :  { %v1100_v18 = vpack.c.bf16 %v1043_v15, %v1042_v14  ;;  %v2482_v19 = vpop.f32.mrb[48].mxu1 }
 0x1d8   :  { %v848_v21 = vadd.f32 %v2482_v19, %v3046_v35  ;;  %v839_v22 = vpop.f32.mrb[49].mxu1 }
 0x1d9   :  { %v840_v23 = vadd.f32 %v3046_v35, %v839_v22  ;;  %v2483_v24 = vpop.f32.mrb[50].mxu1  ;;  %2544 = vmatprep.mubr.msk.bf16.mxu0 %vm644_vm1, %v1100_v18 }
 0x1da   :  { %v851_v25 = vadd.f32 %v2483_v24, %v3046_v35  ;;  %v842_v26 = vpop.f32.mrb[51].mxu1  ;;  %2545 = vmatmul.mubr.msk.bf16.gmra.mrb[44].mxu0 %vm644_vm1, %v1101_v16  ;;  %v1048_v20 = vmax.f32 %v848_v21, 0.0 }
 0x1db   :  { %v843_v17 = vadd.f32 %v3046_v35, %v842_v26  ;;  %v1046_v49 = vmax.f32 %v840_v23, 0.0 }
 0x1dc   :  { %v1049_v46 = vmax.f32 %v851_v25, 0.0 }
 0x1dd   :  { %v1047_v10 = vmax.f32 %v843_v17, 0.0 }
 0x1de   :  { %v1103_v13 = vpack.c.bf16 %v1049_v46, %v1048_v20 }
 0x1df   :  { %v1102_v41 = vpack.c.bf16 %v1047_v10, %v1046_v49  ;;  %v2486_v44 = vpop.f32.mrb[52].mxu1 }
 0x1e0   :  { %v864_v7 = vadd.f32 %v2486_v44, %v3046_v35  ;;  %v855_v11 = vpop.f32.mrb[53].mxu1 }
 0x1e1   :  { %v856_v27 = vadd.f32 %v3046_v35, %v855_v11  ;;  %v2487_v28 = vpop.f32.mrb[54].mxu1  ;;  %2548 = vmatprep.mubr.msk.bf16.mxu0 %vm644_vm1, %v1102_v41 }
 0x1e2   :  { %v867_v29 = vadd.f32 %v2487_v28, %v3046_v35  ;;  %v858_v30 = vpop.f32.mrb[55].mxu1  ;;  %2549 = vmatmul.mubr.msk.bf16.gmra.mrb[48].mxu0 %vm644_vm1, %v1103_v13  ;;  %v1052_v32 = vmax.f32 %v864_v7, 0.0 }
 0x1e3   :  { %v859_v31 = vadd.f32 %v3046_v35, %v858_v30  ;;  %v1050_v34 = vmax.f32 %v856_v27, 0.0 }
 0x1e4   :  { %v1053_v33 = vmax.f32 %v867_v29, 0.0 }
 0x1e5   :  { %v1051_v36 = vmax.f32 %v859_v31, 0.0 }
 0x1e6   :  { %v1105_v37 = vpack.c.bf16 %v1053_v33, %v1052_v32 }
 0x1e7   :  { %v1104_v38 = vpack.c.bf16 %v1051_v36, %v1050_v34  ;;  %v2490_v39 = vpop.f32.mrb[56].mxu1 }
 0x1e8   :  { %v880_v40 = vadd.f32 %v2490_v39, %v3046_v35  ;;  %v871_v42 = vpop.f32.mrb[57].mxu1 }
 0x1e9   :  { %v872_v43 = vadd.f32 %v3046_v35, %v871_v42  ;;  %v2491_v45 = vpop.f32.mrb[58].mxu1  ;;  %2552 = vmatprep.mubr.msk.bf16.mxu0 %vm644_vm1, %v1104_v38 }
 0x1ea   :  { %v883_v47 = vadd.f32 %v2491_v45, %v3046_v35  ;;  %v874_v48 = vpop.f32.mrb[59].mxu1  ;;  %2553 = vmatmul.mubr.msk.bf16.gmra.mrb[52].mxu0 %vm644_vm1, %v1105_v37  ;;  %v1056_v51 = vmax.f32 %v880_v40, 0.0 }
 0x1eb   :  { %v875_v50 = vadd.f32 %v3046_v35, %v874_v48  ;;  %v1054_v53 = vmax.f32 %v872_v43, 0.0 }
 0x1ec   :  { %v1057_v52 = vmax.f32 %v883_v47, 0.0 }
 0x1ed   :  { %v1055_v54 = vmax.f32 %v875_v50, 0.0 }
 0x1ee   :  { %v1107_v55 = vpack.c.bf16 %v1057_v52, %v1056_v51 }
 0x1ef   :  { %v1106_v56 = vpack.c.bf16 %v1055_v54, %v1054_v53  ;;  %v2494_v57 = vpop.f32.mrb[60].mxu1 }
 0x1f0   :  { %v896_v58 = vadd.f32 %v2494_v57, %v3046_v35  ;;  %v887_v59 = vpop.f32.mrb[61].mxu1 }
 0x1f1   :  { %v888_v60 = vadd.f32 %v3046_v35, %v887_v59  ;;  %v2495_v61 = vpop.f32.mrb[62].mxu1  ;;  %2556 = vmatprep.mubr.msk.bf16.mxu0 %vm644_vm1, %v1106_v56 }
 0x1f2   :  { %v899_v62 = vadd.f32 %v2495_v61, %v3046_v35  ;;  %v890_v63 = vpop.f32.mrb[63].mxu1  ;;  %2557 = vmatmul.mubr.msk.bf16.gmra.mrb[56].mxu0 %vm644_vm1, %v1107_v55  ;;  %v1060_v1 = vmax.f32 %v896_v58, 0.0 }
 0x1f3   :  { %v891_v0 = vadd.f32 %v3046_v35, %v890_v63  ;;  %v1058_v3 = vmax.f32 %v888_v60, 0.0 }
 0x1f4   :  { %v1061_v2 = vmax.f32 %v899_v62, 0.0 }
 0x1f5   :  { %v1059_v4 = vmax.f32 %v891_v0, 0.0 }
 0x1f6   :  { %v1109_v5 = vpack.c.bf16 %v1061_v2, %v1060_v1 }
 0x1f7   :  { %v1108_v6 = vpack.c.bf16 %v1059_v4, %v1058_v3  ;;  %v2498_v8 = vpop.f32.mrb[64].mxu1 }
 0x1f8   :  { %v912_v9 = vadd.f32 %v2498_v8, %v3046_v35  ;;  %v903_v12 = vpop.f32.mrb[65].mxu1 }
 0x1f9   :  { %v904_v14 = vadd.f32 %v3046_v35, %v903_v12  ;;  %v2499_v15 = vpop.f32.mrb[66].mxu1  ;;  %2560 = vmatprep.mubr.msk.bf16.mxu0 %vm644_vm1, %v1108_v6 }
 0x1fa   :  { %v915_v16 = vadd.f32 %v2499_v15, %v3046_v35  ;;  %v906_v18 = vpop.f32.mrb[67].mxu1  ;;  %2561 = vmatmul.mubr.msk.bf16.gmra.mrb[60].mxu0 %vm644_vm1, %v1109_v5  ;;  %v1064_v21 = vmax.f32 %v912_v9, 0.0 }
 0x1fb   :  { %v907_v19 = vadd.f32 %v3046_v35, %v906_v18  ;;  %v1062_v23 = vmax.f32 %v904_v14, 0.0 }
 0x1fc   :  { %v1065_v22 = vmax.f32 %v915_v16, 0.0 }
 0x1fd   :  { %v1063_v24 = vmax.f32 %v907_v19, 0.0 }
 0x1fe   :  { %v1111_v25 = vpack.c.bf16 %v1065_v22, %v1064_v21 }
 0x1ff   :  { %v1110_v26 = vpack.c.bf16 %v1063_v24, %v1062_v23  ;;  %v2502_v17 = vpop.f32.mrb[68].mxu1 }
 0x200   :  { %v928_v20 = vadd.f32 %v2502_v17, %v3046_v35  ;;  %v919_v46 = vpop.f32.mrb[69].mxu1 }
 0x201   :  { %v920_v49 = vadd.f32 %v3046_v35, %v919_v46  ;;  %v2503_v10 = vpop.f32.mrb[70].mxu1  ;;  %2564 = vmatprep.mubr.msk.bf16.mxu0 %vm644_vm1, %v1110_v26 }
 0x202   :  { %v931_v13 = vadd.f32 %v2503_v10, %v3046_v35  ;;  %v922_v41 = vpop.f32.mrb[71].mxu1  ;;  %2565 = vmatmul.mubr.msk.bf16.gmra.mrb[64].mxu0 %vm644_vm1, %v1111_v25  ;;  %v1068_v7 = vmax.f32 %v928_v20, 0.0 }
 0x203   :  { %v923_v44 = vadd.f32 %v3046_v35, %v922_v41  ;;  %v1066_v27 = vmax.f32 %v920_v49, 0.0 }
 0x204   :  { %v1069_v11 = vmax.f32 %v931_v13, 0.0 }
 0x205   :  { %v1067_v28 = vmax.f32 %v923_v44, 0.0 }
 0x206   :  { %v1113_v29 = vpack.c.bf16 %v1069_v11, %v1068_v7 }
 0x207   :  { %v1112_v30 = vpack.c.bf16 %v1067_v28, %v1066_v27  ;;  %v2506_v31 = vpop.f32.mrb[72].mxu1 }
 0x208   :  { %v944_v32 = vadd.f32 %v2506_v31, %v3046_v35  ;;  %v935_v33 = vpop.f32.mrb[73].mxu1 }
 0x209   :  { %v936_v34 = vadd.f32 %v3046_v35, %v935_v33  ;;  %v2507_v36 = vpop.f32.mrb[74].mxu1  ;;  %2568 = vmatprep.mubr.msk.bf16.mxu0 %vm644_vm1, %v1112_v30 }
 0x20a   :  { %v947_v37 = vadd.f32 %v2507_v36, %v3046_v35  ;;  %v938_v38 = vpop.f32.mrb[75].mxu1  ;;  %2569 = vmatmul.mubr.msk.bf16.gmra.mrb[68].mxu0 %vm644_vm1, %v1113_v29  ;;  %v1072_v40 = vmax.f32 %v944_v32, 0.0 }
 0x20b   :  { %v939_v39 = vadd.f32 %v3046_v35, %v938_v38  ;;  %v1070_v43 = vmax.f32 %v936_v34, 0.0 }
 0x20c   :  { %v1073_v42 = vmax.f32 %v947_v37, 0.0 }
 0x20d   :  { %v1071_v45 = vmax.f32 %v939_v39, 0.0 }
 0x20e   :  { %v1115_v47 = vpack.c.bf16 %v1073_v42, %v1072_v40 }
 0x20f   :  { %v1114_v48 = vpack.c.bf16 %v1071_v45, %v1070_v43  ;;  %v2510_v50 = vpop.f32.mrb[76].mxu1 }
 0x210   :  { %v960_v51 = vadd.f32 %v2510_v50, %v3046_v35  ;;  %v951_v52 = vpop.f32.mrb[77].mxu1 }
 0x211   :  { %v952_v53 = vadd.f32 %v3046_v35, %v951_v52  ;;  %v2511_v54 = vpop.f32.mrb[78].mxu1  ;;  %2572 = vmatprep.mubr.msk.bf16.mxu0 %vm644_vm1, %v1114_v48 }
 0x212   :  { %v963_v55 = vadd.f32 %v2511_v54, %v3046_v35  ;;  %v954_v56 = vpop.f32.mrb[79].mxu1  ;;  %2573 = vmatmul.mubr.msk.bf16.gmra.mrb[72].mxu0 %vm644_vm1, %v1115_v47  ;;  %v1076_v58 = vmax.f32 %v960_v51, 0.0 }
 0x213   :  { %v955_v57 = vadd.f32 %v3046_v35, %v954_v56  ;;  %v1074_v60 = vmax.f32 %v952_v53, 0.0 }
 0x214   :  { %v1077_v59 = vmax.f32 %v963_v55, 0.0 }
 0x215   :  { %v1075_v61 = vmax.f32 %v955_v57, 0.0 }
 0x216   :  { %v1117_v62 = vpack.c.bf16 %v1077_v59, %v1076_v58  ;;  %v3147_v58 = vld [vmem:[%s3231_s6] ss:$0 sm:$0xff]  ;;  %s2630_s6 = smov [#allocation2]  }
 0x217   :  { %v1116_v63 = vpack.c.bf16 %v1075_v61, %v1074_v60  ;;  %v2514_v0 = vpop.f32.mrb[80].mxu1  ;;  %s1859_s17 = sshll.u32 %s2630_s6, 4  ;;  %s1860_s17 = int_to_ptr.vmem [resolvable:$true] %s1859_s17 }
 0x218   :  { %v976_v1 = vadd.f32 %v2514_v0, %v3046_v35  ;;  %v967_v2 = vpop.f32.mrb[81].mxu1  ;;  %s2606_s18 = scalar_lea.vmem %s1860_s17, 4096  ;;  %p2611_p1 = scmp.lt.s32.totalorder %s1860_s17, %s1860_s17 }
 0x219   :  { %v968_v3 = vadd.f32 %v3046_v35, %v967_v2  ;;  %v2515_v4 = vpop.f32.mrb[82].mxu1  ;;  %2576 = vmatprep.mubr.msk.bf16.mxu0 %vm644_vm1, %v1116_v63  ;;  %p2607_p0 = scmp.ne.s32.totalorder %s1860_s17, %s2606_s18  ;;  %p2612_p2 = scmp.lt.s32.totalorder %s2606_s18, %s2606_s18 }
 0x21a   :  { %v979_v5 = vadd.f32 %v2515_v4, %v3046_v35  ;;  %v970_v6 = vpop.f32.mrb[83].mxu1  ;;  %2577 = vmatmul.mubr.msk.bf16.gmra.mrb[76].mxu0 %vm644_vm1, %v1117_v62  ;;  %v1080_v9 = vmax.f32 %v976_v1, 0.0 }
 0x21b   :  { %v971_v8 = vadd.f32 %v3046_v35, %v970_v6  ;;  %v1078_v14 = vmax.f32 %v968_v3, 0.0  ;;  %p2613_p3 = por %p2612_p2, %p2611_p1 }
 0x21c   :  { %v1081_v12 = vmax.f32 %v979_v5, 0.0 }
 0x21d   :  { %v1079_v15 = vmax.f32 %v971_v8, 0.0  ;;  %p2614_p4 = pnand %p2613_p3, %p2607_p0 }
 0x21e   :  { %v1119_v16 = vpack.c.bf16 %v1081_v12, %v1080_v9 }
 0x21f   :  { %v1118_v18 = vpack.c.bf16 %v1079_v15, %v1078_v14  ;;  %v2518_v19 = vpop.f32.mrb[84].mxu1 }
 0x220   :  { %v992_v21 = vadd.f32 %v2518_v19, %v3046_v35  ;;  %v983_v22 = vpop.f32.mrb[85].mxu1 }
 0x221   :  { %v984_v23 = vadd.f32 %v3046_v35, %v983_v22  ;;  %v2519_v24 = vpop.f32.mrb[86].mxu1  ;;  %2580 = vmatprep.mubr.msk.bf16.mxu0 %vm644_vm1, %v1118_v18 }
 0x222   :  { %v995_v25 = vadd.f32 %v2519_v24, %v3046_v35  ;;  %v986_v26 = vpop.f32.mrb[87].mxu1  ;;  %2581 = vmatmul.mubr.msk.bf16.gmra.mrb[80].mxu0 %vm644_vm1, %v1119_v16  ;;  %v1084_v20 = vmax.f32 %v992_v21, 0.0 }
 0x223   :  { %v987_v17 = vadd.f32 %v3046_v35, %v986_v26  ;;  %v1082_v49 = vmax.f32 %v984_v23, 0.0 }
 0x224   :  { %v1085_v46 = vmax.f32 %v995_v25, 0.0 }
 0x225   :  { %v1083_v10 = vmax.f32 %v987_v17, 0.0 }
 0x226   :  { %v1121_v13 = vpack.c.bf16 %v1085_v46, %v1084_v20 }
 0x227   :  { %v1120_v41 = vpack.c.bf16 %v1083_v10, %v1082_v49  ;;  %v2522_v44 = vpop.f32.mrb[88].mxu1 }
 0x228   :  { %v1008_v7 = vadd.f32 %v2522_v44, %v3046_v35  ;;  %v999_v11 = vpop.f32.mrb[89].mxu1 }
 0x229   :  { %v1000_v27 = vadd.f32 %v3046_v35, %v999_v11  ;;  %v2523_v28 = vpop.f32.mrb[90].mxu1  ;;  %2584 = vmatprep.mubr.msk.bf16.mxu0 %vm644_vm1, %v1120_v41 }
 0x22a   :  { %v1011_v29 = vadd.f32 %v2523_v28, %v3046_v35  ;;  %v1002_v30 = vpop.f32.mrb[91].mxu1  ;;  %2585 = vmatmul.mubr.msk.bf16.gmra.mrb[84].mxu0 %vm644_vm1, %v1121_v13  ;;  %v1088_v32 = vmax.f32 %v1008_v7, 0.0 }
 0x22b   :  { %v1003_v31 = vadd.f32 %v3046_v35, %v1002_v30  ;;  %v1086_v34 = vmax.f32 %v1000_v27, 0.0 }
 0x22c   :  { %v1089_v33 = vmax.f32 %v1011_v29, 0.0 }
 0x22d   :  { %v1087_v36 = vmax.f32 %v1003_v31, 0.0 }
 0x22e   :  { %v1123_v37 = vpack.c.bf16 %v1089_v33, %v1088_v32 }
 0x22f   :  { %v1122_v38 = vpack.c.bf16 %v1087_v36, %v1086_v34  ;;  %v2526_v39 = vpop.f32.mrb[92].mxu1 }
 0x230   :  { %v1024_v40 = vadd.f32 %v2526_v39, %v3046_v35  ;;  %v1015_v42 = vpop.f32.mrb[93].mxu1 }
 0x231   :  { %v1016_v43 = vadd.f32 %v3046_v35, %v1015_v42  ;;  %v2527_v45 = vpop.f32.mrb[94].mxu1  ;;  %2588 = vmatprep.mubr.msk.bf16.mxu0 %vm644_vm1, %v1122_v38 }
 0x232   :  { %v1027_v47 = vadd.f32 %v2527_v45, %v3046_v35  ;;  %v1018_v48 = vpop.f32.mrb[95].mxu1  ;;  %2589 = vmatmul.mubr.msk.bf16.gmra.mrb[88].mxu0 %vm644_vm1, %v1123_v37  ;;  %v1092_v51 = vmax.f32 %v1024_v40, 0.0 }
 0x233   :  { %v1019_v50 = vadd.f32 %v3046_v35, %v1018_v48  ;;  %v1090_v53 = vmax.f32 %v1016_v43, 0.0 }
 0x234   :  { %v1093_v52 = vmax.f32 %v1027_v47, 0.0 }
 0x235   :  { %v1091_v54 = vmax.f32 %v1019_v50, 0.0 }
 0x236   :  { %v1125_v55 = vpack.c.bf16 %v1093_v52, %v1092_v51 }
 0x237   :  { %v1124_v56 = vpack.c.bf16 %v1091_v54, %v1090_v53 }
 0x239   :  { %2592 = vmatprep.mubr.msk.bf16.mxu0 %vm644_vm1, %v1124_v56 }
 0x23a   :  { %2593 = vmatmul.mubr.msk.bf16.gmra.mrb[92].mxu0 %vm644_vm1, %v1125_v55 }
 0x295   :  { %v2534_v57 = vpop.f32.mrb[32].mxu0 }
 0x296   :  { %v1279_v59 = vpop.f32.mrb[33].mxu0  ;;  %v1288_v35 = vadd.f32 %v2534_v57, %v3147_v58 }
 0x297   :  { %v2535_v60 = vpop.f32.mrb[34].mxu0  ;;  %v1280_v63 = vadd.f32 %v3147_v58, %v1279_v59 }
 0x298   :  { %v1291_v61 = vadd.f32 %v2535_v60, %v3147_v58  ;;  %v1282_v62 = vpop.f32.mrb[35].mxu0 }
 0x299   :  { %v1283_v0 = vadd.f32 %v3147_v58, %v1282_v62 }
 0x29a   :  { %v2110_v1 = vpack.c.bf16 %v1291_v61, %v1288_v35 }
 0x29b   :  { %v2105_v2 = vpack.c.bf16 %v1283_v0, %v1280_v63 }
 0x29c   :  { %2262 = vst [vmem:[#allocation2 + $0x8] sm:$0xff] %v2110_v1  }
 0x29d   :  { %2106 = vst [vmem:[#allocation2] sm:$0xff] %v2105_v2   ;;  %v2538_v3 = vpop.f32.mrb[36].mxu0 }
 0x29e   :  { %v1295_v4 = vpop.f32.mrb[37].mxu0  ;;  %v1304_v6 = vadd.f32 %v2538_v3, %v3147_v58 }
 0x29f   :  { %v2539_v5 = vpop.f32.mrb[38].mxu0  ;;  %v1296_v12 = vadd.f32 %v3147_v58, %v1295_v4 }
 0x2a0   :  { %v1307_v8 = vadd.f32 %v2539_v5, %v3147_v58  ;;  %v1298_v9 = vpop.f32.mrb[39].mxu0 }
 0x2a1   :  { %v1299_v14 = vadd.f32 %v3147_v58, %v1298_v9 }
 0x2a2   :  { %v2120_v15 = vpack.c.bf16 %v1307_v8, %v1304_v6 }
 0x2a3   :  { %v2115_v16 = vpack.c.bf16 %v1299_v14, %v1296_v12 }
 0x2a4   :  { %2264 = vst [vmem:[#allocation2 + $0x18] sm:$0xff] %v2120_v15  }
 0x2a5   :  { %2263 = vst [vmem:[#allocation2 + $0x10] sm:$0xff] %v2115_v16   ;;  %v2542_v18 = vpop.f32.mrb[40].mxu0 }
 0x2a6   :  { %v1311_v19 = vpop.f32.mrb[41].mxu0  ;;  %v1320_v22 = vadd.f32 %v2542_v18, %v3147_v58 }
 0x2a7   :  { %v2543_v21 = vpop.f32.mrb[42].mxu0  ;;  %v1312_v25 = vadd.f32 %v3147_v58, %v1311_v19 }
 0x2a8   :  { %v1323_v23 = vadd.f32 %v2543_v21, %v3147_v58  ;;  %v1314_v24 = vpop.f32.mrb[43].mxu0 }
 0x2a9   :  { %v1315_v26 = vadd.f32 %v3147_v58, %v1314_v24 }
 0x2aa   :  { %v2130_v17 = vpack.c.bf16 %v1323_v23, %v1320_v22 }
 0x2ab   :  { %v2125_v20 = vpack.c.bf16 %v1315_v26, %v1312_v25 }
 0x2ac   :  { %2266 = vst [vmem:[#allocation2 + $0x28] sm:$0xff] %v2130_v17  }
 0x2ad   :  { %2265 = vst [vmem:[#allocation2 + $0x20] sm:$0xff] %v2125_v20   ;;  %v2546_v46 = vpop.f32.mrb[44].mxu0 }
 0x2ae   :  { %v1327_v49 = vpop.f32.mrb[45].mxu0  ;;  %v1336_v13 = vadd.f32 %v2546_v46, %v3147_v58 }
 0x2af   :  { %v2547_v10 = vpop.f32.mrb[46].mxu0  ;;  %v1328_v7 = vadd.f32 %v3147_v58, %v1327_v49 }
 0x2b0   :  { %v1339_v41 = vadd.f32 %v2547_v10, %v3147_v58  ;;  %v1330_v44 = vpop.f32.mrb[47].mxu0 }
 0x2b1   :  { %v1331_v11 = vadd.f32 %v3147_v58, %v1330_v44 }
 0x2b2   :  { %v2140_v27 = vpack.c.bf16 %v1339_v41, %v1336_v13 }
 0x2b3   :  { %v2135_v28 = vpack.c.bf16 %v1331_v11, %v1328_v7 }
 0x2b4   :  { %2268 = vst [vmem:[#allocation2 + $0x38] sm:$0xff] %v2140_v27  }
 0x2b5   :  { %2267 = vst [vmem:[#allocation2 + $0x30] sm:$0xff] %v2135_v28   ;;  %v2550_v29 = vpop.f32.mrb[48].mxu0 }
 0x2b6   :  { %v1343_v30 = vpop.f32.mrb[49].mxu0  ;;  %v1352_v32 = vadd.f32 %v2550_v29, %v3147_v58 }
 0x2b7   :  { %v2551_v31 = vpop.f32.mrb[50].mxu0  ;;  %v1344_v36 = vadd.f32 %v3147_v58, %v1343_v30 }
 0x2b8   :  { %v1355_v33 = vadd.f32 %v2551_v31, %v3147_v58  ;;  %v1346_v34 = vpop.f32.mrb[51].mxu0 }
 0x2b9   :  { %v1347_v37 = vadd.f32 %v3147_v58, %v1346_v34 }
 0x2ba   :  { %v2150_v38 = vpack.c.bf16 %v1355_v33, %v1352_v32 }
 0x2bb   :  { %v2145_v39 = vpack.c.bf16 %v1347_v37, %v1344_v36 }
 0x2bc   :  { %2270 = vst [vmem:[#allocation2 + $0x48] sm:$0xff] %v2150_v38  }
 0x2bd   :  { %2269 = vst [vmem:[#allocation2 + $0x40] sm:$0xff] %v2145_v39   ;;  %v2554_v40 = vpop.f32.mrb[52].mxu0 }
 0x2be   :  { %v1359_v42 = vpop.f32.mrb[53].mxu0  ;;  %v1368_v45 = vadd.f32 %v2554_v40, %v3147_v58 }
 0x2bf   :  { %v2555_v43 = vpop.f32.mrb[54].mxu0  ;;  %v1360_v50 = vadd.f32 %v3147_v58, %v1359_v42 }
 0x2c0   :  { %v1371_v47 = vadd.f32 %v2555_v43, %v3147_v58  ;;  %v1362_v48 = vpop.f32.mrb[55].mxu0 }
 0x2c1   :  { %v1363_v51 = vadd.f32 %v3147_v58, %v1362_v48 }
 0x2c2   :  { %v2160_v52 = vpack.c.bf16 %v1371_v47, %v1368_v45 }
 0x2c3   :  { %v2155_v53 = vpack.c.bf16 %v1363_v51, %v1360_v50 }
 0x2c4   :  { %2272 = vst [vmem:[#allocation2 + $0x58] sm:$0xff] %v2160_v52  }
 0x2c5   :  { %2271 = vst [vmem:[#allocation2 + $0x50] sm:$0xff] %v2155_v53   ;;  %v2558_v54 = vpop.f32.mrb[56].mxu0 }
 0x2c6   :  { %v1375_v55 = vpop.f32.mrb[57].mxu0  ;;  %v1384_v57 = vadd.f32 %v2558_v54, %v3147_v58 }
 0x2c7   :  { %v2559_v56 = vpop.f32.mrb[58].mxu0  ;;  %v1376_v35 = vadd.f32 %v3147_v58, %v1375_v55 }
 0x2c8   :  { %v1387_v59 = vadd.f32 %v2559_v56, %v3147_v58  ;;  %v1378_v60 = vpop.f32.mrb[59].mxu0 }
 0x2c9   :  { %v1379_v61 = vadd.f32 %v3147_v58, %v1378_v60 }
 0x2ca   :  { %v2170_v62 = vpack.c.bf16 %v1387_v59, %v1384_v57 }
 0x2cb   :  { %v2165_v63 = vpack.c.bf16 %v1379_v61, %v1376_v35 }
 0x2cc   :  { %2274 = vst [vmem:[#allocation2 + $0x68] sm:$0xff] %v2170_v62  }
 0x2cd   :  { %2273 = vst [vmem:[#allocation2 + $0x60] sm:$0xff] %v2165_v63   ;;  %v2562_v0 = vpop.f32.mrb[60].mxu0 }
 0x2ce   :  { %v1391_v1 = vpop.f32.mrb[61].mxu0  ;;  %v1400_v3 = vadd.f32 %v2562_v0, %v3147_v58 }
 0x2cf   :  { %v2563_v2 = vpop.f32.mrb[62].mxu0  ;;  %v1392_v6 = vadd.f32 %v3147_v58, %v1391_v1 }
 0x2d0   :  { %v1403_v4 = vadd.f32 %v2563_v2, %v3147_v58  ;;  %v1394_v5 = vpop.f32.mrb[63].mxu0 }
 0x2d1   :  { %v1395_v8 = vadd.f32 %v3147_v58, %v1394_v5 }
 0x2d2   :  { %v2180_v9 = vpack.c.bf16 %v1403_v4, %v1400_v3 }
 0x2d3   :  { %v2175_v12 = vpack.c.bf16 %v1395_v8, %v1392_v6 }
 0x2d4   :  { %2276 = vst [vmem:[#allocation2 + $0x78] sm:$0xff] %v2180_v9  }
 0x2d5   :  { %2275 = vst [vmem:[#allocation2 + $0x70] sm:$0xff] %v2175_v12   ;;  %v2566_v14 = vpop.f32.mrb[64].mxu0 }
 0x2d6   :  { %v1407_v15 = vpop.f32.mrb[65].mxu0  ;;  %v1416_v18 = vadd.f32 %v2566_v14, %v3147_v58 }
 0x2d7   :  { %v2567_v16 = vpop.f32.mrb[66].mxu0  ;;  %v1408_v22 = vadd.f32 %v3147_v58, %v1407_v15 }
 0x2d8   :  { %v1419_v19 = vadd.f32 %v2567_v16, %v3147_v58  ;;  %v1410_v21 = vpop.f32.mrb[67].mxu0 }
 0x2d9   :  { %v1411_v23 = vadd.f32 %v3147_v58, %v1410_v21 }
 0x2da   :  { %v2190_v24 = vpack.c.bf16 %v1419_v19, %v1416_v18 }
 0x2db   :  { %v2185_v25 = vpack.c.bf16 %v1411_v23, %v1408_v22 }
 0x2dc   :  { %2278 = vst [vmem:[#allocation2 + $0x88] sm:$0xff] %v2190_v24  }
 0x2dd   :  { %2277 = vst [vmem:[#allocation2 + $0x80] sm:$0xff] %v2185_v25   ;;  %v2570_v26 = vpop.f32.mrb[68].mxu0 }
 0x2de   :  { %v1423_v17 = vpop.f32.mrb[69].mxu0  ;;  %v1432_v46 = vadd.f32 %v2570_v26, %v3147_v58 }
 0x2df   :  { %v2571_v20 = vpop.f32.mrb[70].mxu0  ;;  %v1424_v13 = vadd.f32 %v3147_v58, %v1423_v17 }
 0x2e0   :  { %v1435_v49 = vadd.f32 %v2571_v20, %v3147_v58  ;;  %v1426_v10 = vpop.f32.mrb[71].mxu0 }
 0x2e1   :  { %v1427_v41 = vadd.f32 %v3147_v58, %v1426_v10 }
 0x2e2   :  { %v2200_v44 = vpack.c.bf16 %v1435_v49, %v1432_v46 }
 0x2e3   :  { %v2195_v7 = vpack.c.bf16 %v1427_v41, %v1424_v13 }
 0x2e4   :  { %2280 = vst [vmem:[#allocation2 + $0x98] sm:$0xff] %v2200_v44  }
 0x2e5   :  { %2279 = vst [vmem:[#allocation2 + $0x90] sm:$0xff] %v2195_v7   ;;  %v2574_v11 = vpop.f32.mrb[72].mxu0 }
 0x2e6   :  { %v1439_v27 = vpop.f32.mrb[73].mxu0  ;;  %v1448_v29 = vadd.f32 %v2574_v11, %v3147_v58 }
 0x2e7   :  { %v2575_v28 = vpop.f32.mrb[74].mxu0  ;;  %v1440_v32 = vadd.f32 %v3147_v58, %v1439_v27 }
 0x2e8   :  { %v1451_v30 = vadd.f32 %v2575_v28, %v3147_v58  ;;  %v1442_v31 = vpop.f32.mrb[75].mxu0 }
 0x2e9   :  { %v1443_v33 = vadd.f32 %v3147_v58, %v1442_v31 }
 0x2ea   :  { %v2210_v34 = vpack.c.bf16 %v1451_v30, %v1448_v29 }
 0x2eb   :  { %v2205_v36 = vpack.c.bf16 %v1443_v33, %v1440_v32 }
 0x2ec   :  { %2282 = vst [vmem:[#allocation2 + $0xa8] sm:$0xff] %v2210_v34  }
 0x2ed   :  { %2281 = vst [vmem:[#allocation2 + $0xa0] sm:$0xff] %v2205_v36   ;;  %v2578_v37 = vpop.f32.mrb[76].mxu0 }
 0x2ee   :  { %v1455_v38 = vpop.f32.mrb[77].mxu0  ;;  %v1464_v40 = vadd.f32 %v2578_v37, %v3147_v58 }
 0x2ef   :  { %v2579_v39 = vpop.f32.mrb[78].mxu0  ;;  %v1456_v45 = vadd.f32 %v3147_v58, %v1455_v38 }
 0x2f0   :  { %v1467_v42 = vadd.f32 %v2579_v39, %v3147_v58  ;;  %v1458_v43 = vpop.f32.mrb[79].mxu0 }
 0x2f1   :  { %v1459_v47 = vadd.f32 %v3147_v58, %v1458_v43 }
 0x2f2   :  { %v2220_v48 = vpack.c.bf16 %v1467_v42, %v1464_v40 }
 0x2f3   :  { %v2215_v50 = vpack.c.bf16 %v1459_v47, %v1456_v45 }
 0x2f4   :  { %2284 = vst [vmem:[#allocation2 + $0xb8] sm:$0xff] %v2220_v48  }
 0x2f5   :  { %2283 = vst [vmem:[#allocation2 + $0xb0] sm:$0xff] %v2215_v50   ;;  %v2582_v51 = vpop.f32.mrb[80].mxu0 }
 0x2f6   :  { %v1471_v52 = vpop.f32.mrb[81].mxu0  ;;  %v1480_v54 = vadd.f32 %v2582_v51, %v3147_v58 }
 0x2f7   :  { %v2583_v53 = vpop.f32.mrb[82].mxu0  ;;  %v1472_v57 = vadd.f32 %v3147_v58, %v1471_v52 }
 0x2f8   :  { %v1483_v55 = vadd.f32 %v2583_v53, %v3147_v58  ;;  %v1474_v56 = vpop.f32.mrb[83].mxu0 }
 0x2f9   :  { %v1475_v59 = vadd.f32 %v3147_v58, %v1474_v56 }
 0x2fa   :  { %v2230_v60 = vpack.c.bf16 %v1483_v55, %v1480_v54 }
 0x2fb   :  { %v2225_v35 = vpack.c.bf16 %v1475_v59, %v1472_v57 }
 0x2fc   :  { %2286 = vst [vmem:[#allocation2 + $0xc8] sm:$0xff] %v2230_v60  }
 0x2fd   :  { %2285 = vst [vmem:[#allocation2 + $0xc0] sm:$0xff] %v2225_v35   ;;  %v2586_v61 = vpop.f32.mrb[84].mxu0 }
 0x2fe   :  { %v1487_v62 = vpop.f32.mrb[85].mxu0  ;;  %v1496_v0 = vadd.f32 %v2586_v61, %v3147_v58 }
 0x2ff   :  { %v2587_v63 = vpop.f32.mrb[86].mxu0  ;;  %v1488_v3 = vadd.f32 %v3147_v58, %v1487_v62 }
 0x300   :  { %v1499_v1 = vadd.f32 %v2587_v63, %v3147_v58  ;;  %v1490_v2 = vpop.f32.mrb[87].mxu0 }
 0x301   :  { %v1491_v4 = vadd.f32 %v3147_v58, %v1490_v2 }
 0x302   :  { %v2240_v5 = vpack.c.bf16 %v1499_v1, %v1496_v0 }
 0x303   :  { %v2235_v6 = vpack.c.bf16 %v1491_v4, %v1488_v3 }
 0x304   :  { %2288 = vst [vmem:[#allocation2 + $0xd8] sm:$0xff] %v2240_v5  }
 0x305   :  { %2287 = vst [vmem:[#allocation2 + $0xd0] sm:$0xff] %v2235_v6   ;;  %v2590_v8 = vpop.f32.mrb[88].mxu0 }
 0x306   :  { %v1503_v9 = vpop.f32.mrb[89].mxu0  ;;  %v1512_v14 = vadd.f32 %v2590_v8, %v3147_v58 }
 0x307   :  { %v2591_v12 = vpop.f32.mrb[90].mxu0  ;;  %v1504_v18 = vadd.f32 %v3147_v58, %v1503_v9 }
 0x308   :  { %v1515_v15 = vadd.f32 %v2591_v12, %v3147_v58  ;;  %v1506_v16 = vpop.f32.mrb[91].mxu0 }
 0x309   :  { %v1507_v19 = vadd.f32 %v3147_v58, %v1506_v16 }
 0x30a   :  { %v2250_v21 = vpack.c.bf16 %v1515_v15, %v1512_v14 }
 0x30b   :  { %v2245_v22 = vpack.c.bf16 %v1507_v19, %v1504_v18 }
 0x30c   :  { %2290 = vst [vmem:[#allocation2 + $0xe8] sm:$0xff] %v2250_v21  }
 0x30d   :  { %2289 = vst [vmem:[#allocation2 + $0xe0] sm:$0xff] %v2245_v22   ;;  %v2594_v23 = vpop.f32.mrb[92].mxu0 }
 0x30e   :  { %v1519_v24 = vpop.f32.mrb[93].mxu0  ;;  %v1528_v26 = vadd.f32 %v2594_v23, %v3147_v58 }
 0x30f   :  { %v2595_v25 = vpop.f32.mrb[94].mxu0  ;;  %v1520_v46 = vadd.f32 %v3147_v58, %v1519_v24 }
 0x310   :  { %v1531_v17 = vadd.f32 %v2595_v25, %v3147_v58  ;;  %v1522_v20 = vpop.f32.mrb[95].mxu0 }
 0x311   :  { %v1523_v49 = vadd.f32 %v3147_v58, %v1522_v20 }
 0x312   :  { %v2260_v10 = vpack.c.bf16 %v1531_v17, %v1528_v26 }
 0x313   :  { %v2255_v13 = vpack.c.bf16 %v1523_v49, %v1520_v46 }
 0x314   :  { %2292 = vst [vmem:[#allocation2 + $0xf8] sm:$0xff] %v2260_v10  }
 0x315   :  { %2291 = vst [vmem:[#allocation2 + $0xf0] sm:$0xff] %v2255_v13  }
 0x316   :  { %2617 = shalt.err (!%p2614_p4)
}
 0x317   :  { %s2618_s21 = scalar_lea.hbm %s3232_s7, 4096 }
 0x318   :  { %p2619_p5 = scmp.ne.s32.totalorder %s3232_s7, %s2618_s21  ;;  %p2622_p6 = scmp.lt.u32.totalorder %s2618_s21, %s3232_s7 }
 0x31a   :  { %p2624_p7 = pnand %p2622_p6, %p2619_p5 }
 0x31c   :  { %2627 = shalt.err (!%p2624_p7)
}
 0x31d   :  { %s2631_s25 = smov 64   ;;  %s2632_s26 = smov 4  }
 0x31e   :  { %1865 = dma.vmem_to_hbm [thread:$0]  %s1860_s17, 4096, %s3232_s7, [#allocation3], %s2631_s25, %s2631_s25, %s2632_s26  }
 0x31f   :  { %2628 = dma.done.wait [#allocation3], 4096  }
 0x320   :  { %2629 = vsyncadd [#allocation3], 4294963200 }
 0x321   :  { %1869 = vsyncpa [#allocation3], 1 }

</bundles_post_ra>
